<compile_context>
chip_gen: v7x
topology: tpu7x:2x2x1
jax: 0.10.0
libtpu: 0.0.40
codegen_flags: <defaults>
</compile_context>

<pallas_src>
import jax
import jax.numpy as jnp
import numpy as np
from jax.experimental import pallas as pl
from jax.experimental.pallas import tpu as pltpu


_MXU_DTYPE = jnp.bfloat16      # native MXU operand dtype on v5e/v6e/v7x


def _round_up(a, m):
    return (a + m - 1) // m * m


def _vmem_capacity_bytes():
    try:
        return int(pltpu.get_tpu_info().vmem_capacity_bytes)
    except Exception:
        return 64 * 1024 * 1024          # conservative default (v7x per-core VMEM)


_VMEM_CAP = _vmem_capacity_bytes()
_VMEM_USABLE = (3 * _VMEM_CAP) // 4      # ~48 MiB on v7x, ~96 MiB on v5e/v6e
_VMEM_LIMIT = int(max(32 * 1024 * 1024, min(_VMEM_USABLE, 100 * 1024 * 1024)))


def _pick_batch_block(n, m_img, working_set_fn, budget, target_rows=1024):
    """Largest divisor of n whose full VMEM working set fits in `budget`,
    stopping once the GEMM M dimension reaches `target_rows`, capped at n//2
    (when n >= 2) so the grid keeps >= 2 steps (v7x dual TC + pipeline overlap).

    NOTE: only exact divisors of n are considered; awkward batch sizes fall
    back to smaller (still correct) blocks."""
    max_nb = max(1, n // 2) if n >= 2 else 1
    best = 1
    for cand in range(1, max_nb + 1):
        if n % cand:
            continue
        if working_set_fn(cand) > budget:
            break
        best = cand
        if cand * m_img >= target_rows:
            break
    return best


def _conv3x3_s2_pallas(x_nhwc, w_hwio, b, *, apply_relu, mxu_dtype=_MXU_DTYPE):
    """3x3 / stride-2 / pad-1 conv (+ optional ReLU applied to the input), NHWC.

    Implicit GEMM: the padded input is parity-split, padded to a sublane-aligned
    row pitch and flattened to (N, 4*Hh*Wh, Cp), so each of the 9 taps is a
    contiguous slab of H_out*Wh rows of the VMEM block; the kernel accumulates
    9 MXU matmuls into an f32 VMEM scratch.  Junk halo-column rows are cropped
    outside the kernel.
    """
    N, H, W, C = x_nhwc.shape
    if H % 2 or W % 2:
        raise ValueError("H and W must be even (FPN feature maps are).")
    KH = KW = 3
    H_out, W_out = H // 2, W // 2

    out_dtype = x_nhwc.dtype
    mxu_itemsize = jnp.dtype(mxu_dtype).itemsize
    out_itemsize = jnp.dtype(out_dtype).itemsize
    sub = 8 * (4 // mxu_itemsize)          # sublane multiple: f32 -> 8, bf16 -> 16
    Cp = _round_up(C, 128)                 # lane-dense channels
    Hh = H_out + 1                         # parity-plane height (incl. halo row)
    Wh = _round_up(W_out + 1, sub)         # parity-plane row pitch (aligned)
    R_img = 4 * Hh * Wh                    # input rows per image (flattened)
    M_img = H_out * Wh                     # GEMM rows per image (incl. junk cols)

    # ---- glue: O(input) rearrangement, fusable into the pallas input ---------
    x_in = jnp.maximum(x_nhwc, 0) if apply_relu else x_nhwc   # ReLU once / element
    x_in = x_in.astype(mxu_dtype)
    x_p = jnp.pad(x_in, ((0, 0), (1, 1), (1, 1), (0, Cp - C)))
    # parity split: parts[2a+b][n, u, v, c] = x_p[n, 2u+a, 2v+b, c]
    parts = [x_p[:, a::2, bb::2, :] for a in (0, 1) for bb in (0, 1)]
    x_par = jnp.stack(parts, axis=1)                     # (N, 4, Hh, W_out+1, Cp)
    x_par = jnp.pad(x_par, ((0, 0), (0, 0), (0, 0), (0, Wh - (W_out + 1)), (0, 0)))
    x_par = x_par.reshape(N, R_img, Cp)                  # one flat row axis / image

    w_p = jnp.pad(w_hwio, ((0, 0), (0, 0), (0, Cp - C), (0, Cp - C)))
    wmat = w_p.reshape(KH * KW, Cp, Cp).astype(mxu_dtype)   # [kh*3+kw, cin, cout]
    bvec = jnp.pad(b, (0, Cp - C)).reshape(1, Cp).astype(jnp.float32)

    # ---- batch tiling: fold N into the GEMM M dimension -----------------------
    def working_set(nb):
        return (2 * nb * R_img * Cp * mxu_itemsize       # input block, double-buffered
                + 2 * nb * M_img * Cp * out_itemsize     # output block, double-buffered
                + nb * M_img * Cp * 4                    # f32 accumulator scratch
                + 2 * KH * KW * Cp * Cp * mxu_itemsize   # weights (2 pipeline copies)
                + 2 * Cp * 4)                            # bias

    NB = _pick_batch_block(N, M_img, working_set, _VMEM_USABLE)
    grid = (N // NB,)
    M_blk = NB * M_img

    def kernel(x_ref, w_ref, b_ref, o_ref, acc_ref):
        # x_ref: (NB, R_img, Cp)  w_ref: (9, Cp, Cp)  b_ref: (1, Cp)
        # o_ref: (NB, H_out, Wh, Cp)  acc_ref: (M_blk, Cp) f32 scratch
        for idx in range(KH * KW):
            kh, kw = idx // KW, idx % KW
            p = (kh % 2) * 2 + (kw % 2)                  # parity plane
            off = p * Hh * Wh + (kh // 2) * Wh + (kw // 2)
            tap = x_ref[:, off:off + M_img, :].reshape(M_blk, Cp)
            contrib = jnp.dot(tap, w_ref[idx], preferred_element_type=jnp.float32)
            if idx == 0:
                acc_ref[...] = contrib
            else:
                acc_ref[...] += contrib
        out = (acc_ref[...] + b_ref[...]).reshape(NB, H_out, Wh, Cp)
        o_ref[...] = out.astype(o_ref.dtype)

    flops = 2 * N * M_img * (KH * KW) * Cp * Cp
    bytes_accessed = (x_par.size * mxu_itemsize + wmat.size * mxu_itemsize
                      + bvec.size * 4 + N * M_img * Cp * out_itemsize)

    out = pl.pallas_call(
        kernel,
        out_shape=jax.ShapeDtypeStruct((N, H_out, Wh, Cp), out_dtype),
        grid_spec=pltpu.PrefetchScalarGridSpec(
            num_scalar_prefetch=0,
            grid=grid,
            in_specs=[
                pl.BlockSpec((NB, R_img, Cp), lambda i: (i, 0, 0)),
                pl.BlockSpec((KH * KW, Cp, Cp), lambda i: (0, 0, 0)),  # resident
                pl.BlockSpec((1, Cp), lambda i: (0, 0)),               # resident
            ],
            out_specs=pl.BlockSpec((NB, H_out, Wh, Cp), lambda i: (i, 0, 0, 0)),
            scratch_shapes=[pltpu.VMEM((M_blk, Cp), jnp.float32)],
        ),
        compiler_params=pltpu.CompilerParams(
            dimension_semantics=("parallel",),            # independent batch tiles
            vmem_limit_bytes=_VMEM_LIMIT,                 # per-generation budget
            allow_input_fusion=[True, True, True],        # fuse glue into operands
        ),
        cost_estimate=pl.CostEstimate(
            flops=int(flops), transcendentals=0,
            bytes_accessed=int(bytes_accessed)),
    )(x_par, wmat, bvec)

    # drop alignment padding (junk output columns and channel padding)
    return out[:, :, :W_out, :C]


def last_level_maxpool_v2_nhwc(x_nhwc, params):
    """NHWC entry point (no layout transposes around the kernels)."""
    x1 = _conv3x3_s2_pallas(x_nhwc, params["w6"], params["b6"], apply_relu=False)
    x2 = _conv3x3_s2_pallas(x1, params["w7"], params["b7"], apply_relu=True)
    return [x1, x2]


def last_level_maxpool_v2(x_nchw, params):
    """Forward pass of LastLevelMaxPoolV2 with the PyTorch (NCHW) interface."""
    x = jnp.transpose(x_nchw, (0, 2, 3, 1))               # NCHW -> NHWC
    x1, x2 = last_level_maxpool_v2_nhwc(x, params)
    return [jnp.transpose(x1, (0, 3, 1, 2)), jnp.transpose(x2, (0, 3, 1, 2))]


# ------------------------- reference (pure JAX) ------------------------------
def _ref_conv(x_nhwc, w_hwio, b, operand_dtype=None):
    xx = x_nhwc if operand_dtype is None else x_nhwc.astype(operand_dtype)
    ww = w_hwio if operand_dtype is None else w_hwio.astype(operand_dtype)
    y = jax.lax.conv_general_dilated(
        xx, ww, window_strides=(2, 2), padding=((1, 1), (1, 1)),
        dimension_numbers=("NHWC", "HWIO", "NHWC"),
        preferred_element_type=jnp.float32)
    return y + b[None, None, None, :].astype(jnp.float32)


def _ref_forward(x_nchw, params, operand_dtype=None):
    x = jnp.transpose(x_nchw, (0, 2, 3, 1))
    x1 = _ref_conv(x, params["w6"], params["b6"], operand_dtype)
    x2 = _ref_conv(jnp.maximum(x1, 0.0), params["w7"], params["b7"], operand_dtype)
    return [jnp.transpose(x1, (0, 3, 1, 2)), jnp.transpose(x2, (0, 3, 1, 2))]


if __name__ == "__main__":
    N, C, H, W = 2, 4, 16, 16
    key = jax.random.PRNGKey(0)
    kx, k1, k2, k3, k4 = jax.random.split(key, 5)

    x = jax.random.normal(kx, (N, C, H, W), dtype=jnp.float32)
    params = {
        "w6": 0.1 * jax.random.normal(k1, (3, 3, C, C), dtype=jnp.float32),
        "b6": 0.1 * jax.random.normal(k2, (C,), dtype=jnp.float32),
        "w7": 0.1 * jax.random.normal(k3, (3, 3, C, C), dtype=jnp.float32),
        "b7": 0.1 * jax.random.normal(k4, (C,), dtype=jnp.float32),
    }

    fwd = jax.jit(last_level_maxpool_v2)
    p6, p7 = fwd(x, params)
    jax.block_until_ready(p6)
    jax.block_until_ready(p7)

    # Exact-path check: reference with the same bf16 MXU operands + f32 accum.
    r6b, r7b = _ref_forward(x, params, operand_dtype=_MXU_DTYPE)
    np.testing.assert_allclose(np.asarray(p6), np.asarray(r6b), atol=2e-3, rtol=2e-3)
    np.testing.assert_allclose(np.asarray(p7), np.asarray(r7b), atol=2e-3, rtol=2e-3)

    # Semantic check vs the full-f32 module: tolerance loosened for bf16 operands.
    r6f, r7f = _ref_forward(x, params)
    np.testing.assert_allclose(np.asarray(p6), np.asarray(r6f), atol=3e-2, rtol=3e-2)
    np.testing.assert_allclose(np.asarray(p7), np.asarray(r7f), atol=3e-2, rtol=3e-2)

    assert p6.shape == (N, C, H // 2, W // 2)
    assert p7.shape == (N, C, H // 4, W // 4)
    print("KERNEL_OK")
</pallas_src>

<mosaic_0001>
module attributes {stable_mosaic.version = 11 : i64} {
  func.func @kernel(%arg0: i32, %arg1: memref<1x576x128xbf16, #tpu.memory_space<vmem>>, %arg2: memref<9x128x128xbf16, #tpu.memory_space<vmem>>, %arg3: memref<1x128xf32, #tpu.memory_space<vmem>>, %arg4: memref<1x8x16x128xf32, #tpu.memory_space<vmem>>, %arg5: memref<128x128xf32, #tpu.memory_space<vmem>>) attributes {dimension_semantics = [#tpu.dimension_semantics<parallel>], iteration_bounds = array<i64: 2>, scalar_prefetch = 0 : i64, scratch_operands = 1 : i64, tpu.core_type = #tpu.core_type<tc>, window_params = [{transform_indices = @transform_0, window_bounds = array<i64: 1, 576, 128>}, {pipeline_mode = #tpu.pipeline_mode<synchronous>, transform_indices = @transform_1, window_bounds = array<i64: 9, 128, 128>}, {pipeline_mode = #tpu.pipeline_mode<synchronous>, transform_indices = @transform_2, window_bounds = array<i64: 1, 128>}, {transform_indices = @transform_3, window_bounds = array<i64: 1, 8, 16, 128>}]} {
    %c0 = arith.constant 0 : index
    %c0_0 = arith.constant 0 : index
    %c0_1 = arith.constant 0 : index
    %0 = vector.load %arg1[%c0, %c0_0, %c0_1] : memref<1x576x128xbf16, #tpu.memory_space<vmem>>, vector<1x128x128xbf16>
    %1 = vector.shape_cast %0 : vector<1x128x128xbf16> to vector<128x128xbf16>
    %c0_2 = arith.constant 0 : index
    %c0_3 = arith.constant 0 : index
    %c0_4 = arith.constant 0 : index
    %2 = vector.load %arg2[%c0_2, %c0_3, %c0_4] : memref<9x128x128xbf16, #tpu.memory_space<vmem>>, vector<1x128x128xbf16>
    %3 = vector.shape_cast %2 : vector<1x128x128xbf16> to vector<128x128xbf16>
    %cst = arith.constant dense<0.000000e+00> : vector<128x128xf32>
    %4 = tpu.matmul %1, %3, %cst {dimension_numbers = #tpu.dot_dimension_numbers<[1], [0], [0], [1], [0, 0, 1, 1], [], []>} : vector<128x128xbf16>, vector<128x128xbf16>, vector<128x128xf32> -> vector<128x128xf32>
    %c0_5 = arith.constant 0 : index
    %c0_6 = arith.constant 0 : index
    %5 = vector.load %arg5[%c0_5, %c0_6] : memref<128x128xf32, #tpu.memory_space<vmem>>, vector<128x128xf32>
    tpu.vector_store %arg5[%c0_5, %c0_6], %4 {strides = array<i32>} : memref<128x128xf32, #tpu.memory_space<vmem>>, vector<128x128xf32>,
    %c0_7 = arith.constant 0 : index
    %c144 = arith.constant 144 : index
    %c0_8 = arith.constant 0 : index
    %6 = vector.load %arg1[%c0_7, %c144, %c0_8] : memref<1x576x128xbf16, #tpu.memory_space<vmem>>, vector<1x128x128xbf16>
    %7 = vector.shape_cast %6 : vector<1x128x128xbf16> to vector<128x128xbf16>
    %c1 = arith.constant 1 : index
    %c0_9 = arith.constant 0 : index
    %c0_10 = arith.constant 0 : index
    %8 = vector.load %arg2[%c1, %c0_9, %c0_10] : memref<9x128x128xbf16, #tpu.memory_space<vmem>>, vector<1x128x128xbf16>
    %9 = vector.shape_cast %8 : vector<1x128x128xbf16> to vector<128x128xbf16>
    %cst_11 = arith.constant dense<0.000000e+00> : vector<128x128xf32>
    %10 = tpu.matmul %7, %9, %cst_11 {dimension_numbers = #tpu.dot_dimension_numbers<[1], [0], [0], [1], [0, 0, 1, 1], [], []>} : vector<128x128xbf16>, vector<128x128xbf16>, vector<128x128xf32> -> vector<128x128xf32>
    %c0_12 = arith.constant 0 : index
    %c0_13 = arith.constant 0 : index
    %11 = vector.load %arg5[%c0_12, %c0_13] : memref<128x128xf32, #tpu.memory_space<vmem>>, vector<128x128xf32>
    %12 = arith.addf %11, %10 : vector<128x128xf32>
    %c0_14 = arith.constant 0 : index
    %c0_15 = arith.constant 0 : index
    %13 = vector.load %arg5[%c0_14, %c0_15] : memref<128x128xf32, #tpu.memory_space<vmem>>, vector<128x128xf32>
    tpu.vector_store %arg5[%c0_14, %c0_15], %12 {strides = array<i32>} : memref<128x128xf32, #tpu.memory_space<vmem>>, vector<128x128xf32>,
    %c0_16 = arith.constant 0 : index
    %c1_17 = arith.constant 1 : index
    %c0_18 = arith.constant 0 : index
    %14 = vector.load %arg1[%c0_16, %c1_17, %c0_18] : memref<1x576x128xbf16, #tpu.memory_space<vmem>>, vector<1x128x128xbf16>
    %15 = vector.shape_cast %14 : vector<1x128x128xbf16> to vector<128x128xbf16>
    %c2 = arith.constant 2 : index
    %c0_19 = arith.constant 0 : index
    %c0_20 = arith.constant 0 : index
    %16 = vector.load %arg2[%c2, %c0_19, %c0_20] : memref<9x128x128xbf16, #tpu.memory_space<vmem>>, vector<1x128x128xbf16>
    %17 = vector.shape_cast %16 : vector<1x128x128xbf16> to vector<128x128xbf16>
    %cst_21 = arith.constant dense<0.000000e+00> : vector<128x128xf32>
    %18 = tpu.matmul %15, %17, %cst_21 {dimension_numbers = #tpu.dot_dimension_numbers<[1], [0], [0], [1], [0, 0, 1, 1], [], []>} : vector<128x128xbf16>, vector<128x128xbf16>, vector<128x128xf32> -> vector<128x128xf32>
    %c0_22 = arith.constant 0 : index
    %c0_23 = arith.constant 0 : index
    %19 = vector.load %arg5[%c0_22, %c0_23] : memref<128x128xf32, #tpu.memory_space<vmem>>, vector<128x128xf32>
    %20 = arith.addf %19, %18 : vector<128x128xf32>
    %c0_24 = arith.constant 0 : index
    %c0_25 = arith.constant 0 : index
    %21 = vector.load %arg5[%c0_24, %c0_25] : memref<128x128xf32, #tpu.memory_space<vmem>>, vector<128x128xf32>
    tpu.vector_store %arg5[%c0_24, %c0_25], %20 {strides = array<i32>} : memref<128x128xf32, #tpu.memory_space<vmem>>, vector<128x128xf32>,
    %c0_26 = arith.constant 0 : index
    %c288 = arith.constant 288 : index
    %c0_27 = arith.constant 0 : index
    %22 = vector.load %arg1[%c0_26, %c288, %c0_27] : memref<1x576x128xbf16, #tpu.memory_space<vmem>>, vector<1x128x128xbf16>
    %23 = vector.shape_cast %22 : vector<1x128x128xbf16> to vector<128x128xbf16>
    %c3 = arith.constant 3 : index
    %c0_28 = arith.constant 0 : index
    %c0_29 = arith.constant 0 : index
    %24 = vector.load %arg2[%c3, %c0_28, %c0_29] : memref<9x128x128xbf16, #tpu.memory_space<vmem>>, vector<1x128x128xbf16>
    %25 = vector.shape_cast %24 : vector<1x128x128xbf16> to vector<128x128xbf16>
    %cst_30 = arith.constant dense<0.000000e+00> : vector<128x128xf32>
    %26 = tpu.matmul %23, %25, %cst_30 {dimension_numbers = #tpu.dot_dimension_numbers<[1], [0], [0], [1], [0, 0, 1, 1], [], []>} : vector<128x128xbf16>, vector<128x128xbf16>, vector<128x128xf32> -> vector<128x128xf32>
    %c0_31 = arith.constant 0 : index
    %c0_32 = arith.constant 0 : index
    %27 = vector.load %arg5[%c0_31, %c0_32] : memref<128x128xf32, #tpu.memory_space<vmem>>, vector<128x128xf32>
    %28 = arith.addf %27, %26 : vector<128x128xf32>
    %c0_33 = arith.constant 0 : index
    %c0_34 = arith.constant 0 : index
    %29 = vector.load %arg5[%c0_33, %c0_34] : memref<128x128xf32, #tpu.memory_space<vmem>>, vector<128x128xf32>
    tpu.vector_store %arg5[%c0_33, %c0_34], %28 {strides = array<i32>} : memref<128x128xf32, #tpu.memory_space<vmem>>, vector<128x128xf32>,
    %c0_35 = arith.constant 0 : index
    %c432 = arith.constant 432 : index
    %c0_36 = arith.constant 0 : index
    %30 = vector.load %arg1[%c0_35, %c432, %c0_36] : memref<1x576x128xbf16, #tpu.memory_space<vmem>>, vector<1x128x128xbf16>
    %31 = vector.shape_cast %30 : vector<1x128x128xbf16> to vector<128x128xbf16>
    %c4 = arith.constant 4 : index
    %c0_37 = arith.constant 0 : index
    %c0_38 = arith.constant 0 : index
    %32 = vector.load %arg2[%c4, %c0_37, %c0_38] : memref<9x128x128xbf16, #tpu.memory_space<vmem>>, vector<1x128x128xbf16>
    %33 = vector.shape_cast %32 : vector<1x128x128xbf16> to vector<128x128xbf16>
    %cst_39 = arith.constant dense<0.000000e+00> : vector<128x128xf32>
    %34 = tpu.matmul %31, %33, %cst_39 {dimension_numbers = #tpu.dot_dimension_numbers<[1], [0], [0], [1], [0, 0, 1, 1], [], []>} : vector<128x128xbf16>, vector<128x128xbf16>, vector<128x128xf32> -> vector<128x128xf32>
    %c0_40 = arith.constant 0 : index
    %c0_41 = arith.constant 0 : index
    %35 = vector.load %arg5[%c0_40, %c0_41] : memref<128x128xf32, #tpu.memory_space<vmem>>, vector<128x128xf32>
    %36 = arith.addf %35, %34 : vector<128x128xf32>
    %c0_42 = arith.constant 0 : index
    %c0_43 = arith.constant 0 : index
    %37 = vector.load %arg5[%c0_42, %c0_43] : memref<128x128xf32, #tpu.memory_space<vmem>>, vector<128x128xf32>
    tpu.vector_store %arg5[%c0_42, %c0_43], %36 {strides = array<i32>} : memref<128x128xf32, #tpu.memory_space<vmem>>, vector<128x128xf32>,
    %c0_44 = arith.constant 0 : index
    %c289 = arith.constant 289 : index
    %c0_45 = arith.constant 0 : index
    %38 = vector.load %arg1[%c0_44, %c289, %c0_45] : memref<1x576x128xbf16, #tpu.memory_space<vmem>>, vector<1x128x128xbf16>
    %39 = vector.shape_cast %38 : vector<1x128x128xbf16> to vector<128x128xbf16>
    %c5 = arith.constant 5 : index
    %c0_46 = arith.constant 0 : index
    %c0_47 = arith.constant 0 : index
    %40 = vector.load %arg2[%c5, %c0_46, %c0_47] : memref<9x128x128xbf16, #tpu.memory_space<vmem>>, vector<1x128x128xbf16>
    %41 = vector.shape_cast %40 : vector<1x128x128xbf16> to vector<128x128xbf16>
    %cst_48 = arith.constant dense<0.000000e+00> : vector<128x128xf32>
    %42 = tpu.matmul %39, %41, %cst_48 {dimension_numbers = #tpu.dot_dimension_numbers<[1], [0], [0], [1], [0, 0, 1, 1], [], []>} : vector<128x128xbf16>, vector<128x128xbf16>, vector<128x128xf32> -> vector<128x128xf32>
    %c0_49 = arith.constant 0 : index
    %c0_50 = arith.constant 0 : index
    %43 = vector.load %arg5[%c0_49, %c0_50] : memref<128x128xf32, #tpu.memory_space<vmem>>, vector<128x128xf32>
    %44 = arith.addf %43, %42 : vector<128x128xf32>
    %c0_51 = arith.constant 0 : index
    %c0_52 = arith.constant 0 : index
    %45 = vector.load %arg5[%c0_51, %c0_52] : memref<128x128xf32, #tpu.memory_space<vmem>>, vector<128x128xf32>
    tpu.vector_store %arg5[%c0_51, %c0_52], %44 {strides = array<i32>} : memref<128x128xf32, #tpu.memory_space<vmem>>, vector<128x128xf32>,
    %c0_53 = arith.constant 0 : index
    %c16 = arith.constant 16 : index
    %c0_54 = arith.constant 0 : index
    %46 = vector.load %arg1[%c0_53, %c16, %c0_54] : memref<1x576x128xbf16, #tpu.memory_space<vmem>>, vector<1x128x128xbf16>
    %47 = vector.shape_cast %46 : vector<1x128x128xbf16> to vector<128x128xbf16>
    %c6 = arith.constant 6 : index
    %c0_55 = arith.constant 0 : index
    %c0_56 = arith.constant 0 : index
    %48 = vector.load %arg2[%c6, %c0_55, %c0_56] : memref<9x128x128xbf16, #tpu.memory_space<vmem>>, vector<1x128x128xbf16>
    %49 = vector.shape_cast %48 : vector<1x128x128xbf16> to vector<128x128xbf16>
    %cst_57 = arith.constant dense<0.000000e+00> : vector<128x128xf32>
    %50 = tpu.matmul %47, %49, %cst_57 {dimension_numbers = #tpu.dot_dimension_numbers<[1], [0], [0], [1], [0, 0, 1, 1], [], []>} : vector<128x128xbf16>, vector<128x128xbf16>, vector<128x128xf32> -> vector<128x128xf32>
    %c0_58 = arith.constant 0 : index
    %c0_59 = arith.constant 0 : index
    %51 = vector.load %arg5[%c0_58, %c0_59] : memref<128x128xf32, #tpu.memory_space<vmem>>, vector<128x128xf32>
    %52 = arith.addf %51, %50 : vector<128x128xf32>
    %c0_60 = arith.constant 0 : index
    %c0_61 = arith.constant 0 : index
    %53 = vector.load %arg5[%c0_60, %c0_61] : memref<128x128xf32, #tpu.memory_space<vmem>>, vector<128x128xf32>
    tpu.vector_store %arg5[%c0_60, %c0_61], %52 {strides = array<i32>} : memref<128x128xf32, #tpu.memory_space<vmem>>, vector<128x128xf32>,
    %c0_62 = arith.constant 0 : index
    %c160 = arith.constant 160 : index
    %c0_63 = arith.constant 0 : index
    %54 = vector.load %arg1[%c0_62, %c160, %c0_63] : memref<1x576x128xbf16, #tpu.memory_space<vmem>>, vector<1x128x128xbf16>
    %55 = vector.shape_cast %54 : vector<1x128x128xbf16> to vector<128x128xbf16>
    %c7 = arith.constant 7 : index
    %c0_64 = arith.constant 0 : index
    %c0_65 = arith.constant 0 : index
    %56 = vector.load %arg2[%c7, %c0_64, %c0_65] : memref<9x128x128xbf16, #tpu.memory_space<vmem>>, vector<1x128x128xbf16>
    %57 = vector.shape_cast %56 : vector<1x128x128xbf16> to vector<128x128xbf16>
    %cst_66 = arith.constant dense<0.000000e+00> : vector<128x128xf32>
    %58 = tpu.matmul %55, %57, %cst_66 {dimension_numbers = #tpu.dot_dimension_numbers<[1], [0], [0], [1], [0, 0, 1, 1], [], []>} : vector<128x128xbf16>, vector<128x128xbf16>, vector<128x128xf32> -> vector<128x128xf32>
    %c0_67 = arith.constant 0 : index
    %c0_68 = arith.constant 0 : index
    %59 = vector.load %arg5[%c0_67, %c0_68] : memref<128x128xf32, #tpu.memory_space<vmem>>, vector<128x128xf32>
    %60 = arith.addf %59, %58 : vector<128x128xf32>
    %c0_69 = arith.constant 0 : index
    %c0_70 = arith.constant 0 : index
    %61 = vector.load %arg5[%c0_69, %c0_70] : memref<128x128xf32, #tpu.memory_space<vmem>>, vector<128x128xf32>
    tpu.vector_store %arg5[%c0_69, %c0_70], %60 {strides = array<i32>} : memref<128x128xf32, #tpu.memory_space<vmem>>, vector<128x128xf32>,
    %c0_71 = arith.constant 0 : index
    %c17 = arith.constant 17 : index
    %c0_72 = arith.constant 0 : index
    %62 = vector.load %arg1[%c0_71, %c17, %c0_72] : memref<1x576x128xbf16, #tpu.memory_space<vmem>>, vector<1x128x128xbf16>
    %63 = vector.shape_cast %62 : vector<1x128x128xbf16> to vector<128x128xbf16>
    %c8 = arith.constant 8 : index
    %c0_73 = arith.constant 0 : index
    %c0_74 = arith.constant 0 : index
    %64 = vector.load %arg2[%c8, %c0_73, %c0_74] : memref<9x128x128xbf16, #tpu.memory_space<vmem>>, vector<1x128x128xbf16>
    %65 = vector.shape_cast %64 : vector<1x128x128xbf16> to vector<128x128xbf16>
    %cst_75 = arith.constant dense<0.000000e+00> : vector<128x128xf32>
    %66 = tpu.matmul %63, %65, %cst_75 {dimension_numbers = #tpu.dot_dimension_numbers<[1], [0], [0], [1], [0, 0, 1, 1], [], []>} : vector<128x128xbf16>, vector<128x128xbf16>, vector<128x128xf32> -> vector<128x128xf32>
    %c0_76 = arith.constant 0 : index
    %c0_77 = arith.constant 0 : index
    %67 = vector.load %arg5[%c0_76, %c0_77] : memref<128x128xf32, #tpu.memory_space<vmem>>, vector<128x128xf32>
    %68 = arith.addf %67, %66 : vector<128x128xf32>
    %c0_78 = arith.constant 0 : index
    %c0_79 = arith.constant 0 : index
    %69 = vector.load %arg5[%c0_78, %c0_79] : memref<128x128xf32, #tpu.memory_space<vmem>>, vector<128x128xf32>
    tpu.vector_store %arg5[%c0_78, %c0_79], %68 {strides = array<i32>} : memref<128x128xf32, #tpu.memory_space<vmem>>, vector<128x128xf32>,
    %c0_80 = arith.constant 0 : index
    %c0_81 = arith.constant 0 : index
    %70 = vector.load %arg5[%c0_80, %c0_81] : memref<128x128xf32, #tpu.memory_space<vmem>>, vector<128x128xf32>
    %c0_82 = arith.constant 0 : index
    %c0_83 = arith.constant 0 : index
    %71 = vector.load %arg3[%c0_82, %c0_83] : memref<1x128xf32, #tpu.memory_space<vmem>>, vector<1x128xf32>
    %72 = vector.broadcast %71 : vector<1x128xf32> to vector<128x128xf32>
    %73 = arith.addf %70, %72 : vector<128x128xf32>
    %74 = vector.shape_cast %73 : vector<128x128xf32> to vector<1x8x16x128xf32>
    %c0_84 = arith.constant 0 : index
    %c0_85 = arith.constant 0 : index
    %c0_86 = arith.constant 0 : index
    %c0_87 = arith.constant 0 : index
    %75 = vector.load %arg4[%c0_84, %c0_85, %c0_86, %c0_87] : memref<1x8x16x128xf32, #tpu.memory_space<vmem>>, vector<1x8x16x128xf32>
    tpu.vector_store %arg4[%c0_84, %c0_85, %c0_86, %c0_87], %74 {strides = array<i32>} : memref<1x8x16x128xf32, #tpu.memory_space<vmem>>, vector<1x8x16x128xf32>,
    return
  }
  func.func @transform_0(%arg0: i32) -> (i32, i32, i32) {
    %c0_i32 = arith.constant 0 : i32
    %c0_i32_0 = arith.constant 0 : i32
    %c0_i32_1 = arith.constant 0 : i32
    return %arg0, %c0_i32, %c0_i32_0 : i32, i32, i32
  }
  func.func @transform_1(%arg0: i32) -> (i32, i32, i32) {
    %c0_i32 = arith.constant 0 : i32
    %c0_i32_0 = arith.constant 0 : i32
    %c0_i32_1 = arith.constant 0 : i32
    %c0_i32_2 = arith.constant 0 : i32
    return %c0_i32, %c0_i32_0, %c0_i32_1 : i32, i32, i32
  }
  func.func @transform_2(%arg0: i32) -> (i32, i32) {
    %c0_i32 = arith.constant 0 : i32
    %c0_i32_0 = arith.constant 0 : i32
    %c0_i32_1 = arith.constant 0 : i32
    return %c0_i32, %c0_i32_0 : i32, i32
  }
  func.func @transform_3(%arg0: i32) -> (i32, i32, i32, i32) {
    %c0_i32 = arith.constant 0 : i32
    %c0_i32_0 = arith.constant 0 : i32
    %c0_i32_1 = arith.constant 0 : i32
    %c0_i32_2 = arith.constant 0 : i32
    return %arg0, %c0_i32, %c0_i32_0, %c0_i32_1 : i32, i32, i32, i32
  }
}

module attributes {stable_mosaic.version = 11 : i64} {
  func.func @kernel(%arg0: i32, %arg1: memref<1x320x128xbf16, #tpu.memory_space<vmem>>, %arg2: memref<9x128x128xbf16, #tpu.memory_space<vmem>>, %arg3: memref<1x128xf32, #tpu.memory_space<vmem>>, %arg4: memref<1x4x16x128xf32, #tpu.memory_space<vmem>>, %arg5: memref<64x128xf32, #tpu.memory_space<vmem>>) attributes {dimension_semantics = [#tpu.dimension_semantics<parallel>], iteration_bounds = array<i64: 2>, scalar_prefetch = 0 : i64, scratch_operands = 1 : i64, tpu.core_type = #tpu.core_type<tc>, window_params = [{transform_indices = @transform_0, window_bounds = array<i64: 1, 320, 128>}, {pipeline_mode = #tpu.pipeline_mode<synchronous>, transform_indices = @transform_1, window_bounds = array<i64: 9, 128, 128>}, {pipeline_mode = #tpu.pipeline_mode<synchronous>, transform_indices = @transform_2, window_bounds = array<i64: 1, 128>}, {transform_indices = @transform_3, window_bounds = array<i64: 1, 4, 16, 128>}]} {
    %c0 = arith.constant 0 : index
    %c0_0 = arith.constant 0 : index
    %c0_1 = arith.constant 0 : index
    %0 = vector.load %arg1[%c0, %c0_0, %c0_1] : memref<1x320x128xbf16, #tpu.memory_space<vmem>>, vector<1x64x128xbf16>
    %1 = vector.shape_cast %0 : vector<1x64x128xbf16> to vector<64x128xbf16>
    %c0_2 = arith.constant 0 : index
    %c0_3 = arith.constant 0 : index
    %c0_4 = arith.constant 0 : index
    %2 = vector.load %arg2[%c0_2, %c0_3, %c0_4] : memref<9x128x128xbf16, #tpu.memory_space<vmem>>, vector<1x128x128xbf16>
    %3 = vector.shape_cast %2 : vector<1x128x128xbf16> to vector<128x128xbf16>
    %cst = arith.constant dense<0.000000e+00> : vector<64x128xf32>
    %4 = tpu.matmul %1, %3, %cst {dimension_numbers = #tpu.dot_dimension_numbers<[1], [0], [0], [1], [0, 0, 1, 1], [], []>} : vector<64x128xbf16>, vector<128x128xbf16>, vector<64x128xf32> -> vector<64x128xf32>
    %c0_5 = arith.constant 0 : index
    %c0_6 = arith.constant 0 : index
    %5 = vector.load %arg5[%c0_5, %c0_6] : memref<64x128xf32, #tpu.memory_space<vmem>>, vector<64x128xf32>
    tpu.vector_store %arg5[%c0_5, %c0_6], %4 {strides = array<i32>} : memref<64x128xf32, #tpu.memory_space<vmem>>, vector<64x128xf32>,
    %c0_7 = arith.constant 0 : index
    %c80 = arith.constant 80 : index
    %c0_8 = arith.constant 0 : index
    %6 = vector.load %arg1[%c0_7, %c80, %c0_8] : memref<1x320x128xbf16, #tpu.memory_space<vmem>>, vector<1x64x128xbf16>
    %7 = vector.shape_cast %6 : vector<1x64x128xbf16> to vector<64x128xbf16>
    %c1 = arith.constant 1 : index
    %c0_9 = arith.constant 0 : index
    %c0_10 = arith.constant 0 : index
    %8 = vector.load %arg2[%c1, %c0_9, %c0_10] : memref<9x128x128xbf16, #tpu.memory_space<vmem>>, vector<1x128x128xbf16>
    %9 = vector.shape_cast %8 : vector<1x128x128xbf16> to vector<128x128xbf16>
    %cst_11 = arith.constant dense<0.000000e+00> : vector<64x128xf32>
    %10 = tpu.matmul %7, %9, %cst_11 {dimension_numbers = #tpu.dot_dimension_numbers<[1], [0], [0], [1], [0, 0, 1, 1], [], []>} : vector<64x128xbf16>, vector<128x128xbf16>, vector<64x128xf32> -> vector<64x128xf32>
    %c0_12 = arith.constant 0 : index
    %c0_13 = arith.constant 0 : index
    %11 = vector.load %arg5[%c0_12, %c0_13] : memref<64x128xf32, #tpu.memory_space<vmem>>, vector<64x128xf32>
    %12 = arith.addf %11, %10 : vector<64x128xf32>
    %c0_14 = arith.constant 0 : index
    %c0_15 = arith.constant 0 : index
    %13 = vector.load %arg5[%c0_14, %c0_15] : memref<64x128xf32, #tpu.memory_space<vmem>>, vector<64x128xf32>
    tpu.vector_store %arg5[%c0_14, %c0_15], %12 {strides = array<i32>} : memref<64x128xf32, #tpu.memory_space<vmem>>, vector<64x128xf32>,
    %c0_16 = arith.constant 0 : index
    %c1_17 = arith.constant 1 : index
    %c0_18 = arith.constant 0 : index
    %14 = vector.load %arg1[%c0_16, %c1_17, %c0_18] : memref<1x320x128xbf16, #tpu.memory_space<vmem>>, vector<1x64x128xbf16>
    %15 = vector.shape_cast %14 : vector<1x64x128xbf16> to vector<64x128xbf16>
    %c2 = arith.constant 2 : index
    %c0_19 = arith.constant 0 : index
    %c0_20 = arith.constant 0 : index
    %16 = vector.load %arg2[%c2, %c0_19, %c0_20] : memref<9x128x128xbf16, #tpu.memory_space<vmem>>, vector<1x128x128xbf16>
    %17 = vector.shape_cast %16 : vector<1x128x128xbf16> to vector<128x128xbf16>
    %cst_21 = arith.constant dense<0.000000e+00> : vector<64x128xf32>
    %18 = tpu.matmul %15, %17, %cst_21 {dimension_numbers = #tpu.dot_dimension_numbers<[1], [0], [0], [1], [0, 0, 1, 1], [], []>} : vector<64x128xbf16>, vector<128x128xbf16>, vector<64x128xf32> -> vector<64x128xf32>
    %c0_22 = arith.constant 0 : index
    %c0_23 = arith.constant 0 : index
    %19 = vector.load %arg5[%c0_22, %c0_23] : memref<64x128xf32, #tpu.memory_space<vmem>>, vector<64x128xf32>
    %20 = arith.addf %19, %18 : vector<64x128xf32>
    %c0_24 = arith.constant 0 : index
    %c0_25 = arith.constant 0 : index
    %21 = vector.load %arg5[%c0_24, %c0_25] : memref<64x128xf32, #tpu.memory_space<vmem>>, vector<64x128xf32>
    tpu.vector_store %arg5[%c0_24, %c0_25], %20 {strides = array<i32>} : memref<64x128xf32, #tpu.memory_space<vmem>>, vector<64x128xf32>,
    %c0_26 = arith.constant 0 : index
    %c160 = arith.constant 160 : index
    %c0_27 = arith.constant 0 : index
    %22 = vector.load %arg1[%c0_26, %c160, %c0_27] : memref<1x320x128xbf16, #tpu.memory_space<vmem>>, vector<1x64x128xbf16>
    %23 = vector.shape_cast %22 : vector<1x64x128xbf16> to vector<64x128xbf16>
    %c3 = arith.constant 3 : index
    %c0_28 = arith.constant 0 : index
    %c0_29 = arith.constant 0 : index
    %24 = vector.load %arg2[%c3, %c0_28, %c0_29] : memref<9x128x128xbf16, #tpu.memory_space<vmem>>, vector<1x128x128xbf16>
    %25 = vector.shape_cast %24 : vector<1x128x128xbf16> to vector<128x128xbf16>
    %cst_30 = arith.constant dense<0.000000e+00> : vector<64x128xf32>
    %26 = tpu.matmul %23, %25, %cst_30 {dimension_numbers = #tpu.dot_dimension_numbers<[1], [0], [0], [1], [0, 0, 1, 1], [], []>} : vector<64x128xbf16>, vector<128x128xbf16>, vector<64x128xf32> -> vector<64x128xf32>
    %c0_31 = arith.constant 0 : index
    %c0_32 = arith.constant 0 : index
    %27 = vector.load %arg5[%c0_31, %c0_32] : memref<64x128xf32, #tpu.memory_space<vmem>>, vector<64x128xf32>
    %28 = arith.addf %27, %26 : vector<64x128xf32>
    %c0_33 = arith.constant 0 : index
    %c0_34 = arith.constant 0 : index
    %29 = vector.load %arg5[%c0_33, %c0_34] : memref<64x128xf32, #tpu.memory_space<vmem>>, vector<64x128xf32>
    tpu.vector_store %arg5[%c0_33, %c0_34], %28 {strides = array<i32>} : memref<64x128xf32, #tpu.memory_space<vmem>>, vector<64x128xf32>,
    %c0_35 = arith.constant 0 : index
    %c240 = arith.constant 240 : index
    %c0_36 = arith.constant 0 : index
    %30 = vector.load %arg1[%c0_35, %c240, %c0_36] : memref<1x320x128xbf16, #tpu.memory_space<vmem>>, vector<1x64x128xbf16>
    %31 = vector.shape_cast %30 : vector<1x64x128xbf16> to vector<64x128xbf16>
    %c4 = arith.constant 4 : index
    %c0_37 = arith.constant 0 : index
    %c0_38 = arith.constant 0 : index
    %32 = vector.load %arg2[%c4, %c0_37, %c0_38] : memref<9x128x128xbf16, #tpu.memory_space<vmem>>, vector<1x128x128xbf16>
    %33 = vector.shape_cast %32 : vector<1x128x128xbf16> to vector<128x128xbf16>
    %cst_39 = arith.constant dense<0.000000e+00> : vector<64x128xf32>
    %34 = tpu.matmul %31, %33, %cst_39 {dimension_numbers = #tpu.dot_dimension_numbers<[1], [0], [0], [1], [0, 0, 1, 1], [], []>} : vector<64x128xbf16>, vector<128x128xbf16>, vector<64x128xf32> -> vector<64x128xf32>
    %c0_40 = arith.constant 0 : index
    %c0_41 = arith.constant 0 : index
    %35 = vector.load %arg5[%c0_40, %c0_41] : memref<64x128xf32, #tpu.memory_space<vmem>>, vector<64x128xf32>
    %36 = arith.addf %35, %34 : vector<64x128xf32>
    %c0_42 = arith.constant 0 : index
    %c0_43 = arith.constant 0 : index
    %37 = vector.load %arg5[%c0_42, %c0_43] : memref<64x128xf32, #tpu.memory_space<vmem>>, vector<64x128xf32>
    tpu.vector_store %arg5[%c0_42, %c0_43], %36 {strides = array<i32>} : memref<64x128xf32, #tpu.memory_space<vmem>>, vector<64x128xf32>,
    %c0_44 = arith.constant 0 : index
    %c161 = arith.constant 161 : index
    %c0_45 = arith.constant 0 : index
    %38 = vector.load %arg1[%c0_44, %c161, %c0_45] : memref<1x320x128xbf16, #tpu.memory_space<vmem>>, vector<1x64x128xbf16>
    %39 = vector.shape_cast %38 : vector<1x64x128xbf16> to vector<64x128xbf16>
    %c5 = arith.constant 5 : index
    %c0_46 = arith.constant 0 : index
    %c0_47 = arith.constant 0 : index
    %40 = vector.load %arg2[%c5, %c0_46, %c0_47] : memref<9x128x128xbf16, #tpu.memory_space<vmem>>, vector<1x128x128xbf16>
    %41 = vector.shape_cast %40 : vector<1x128x128xbf16> to vector<128x128xbf16>
    %cst_48 = arith.constant dense<0.000000e+00> : vector<64x128xf32>
    %42 = tpu.matmul %39, %41, %cst_48 {dimension_numbers = #tpu.dot_dimension_numbers<[1], [0], [0], [1], [0, 0, 1, 1], [], []>} : vector<64x128xbf16>, vector<128x128xbf16>, vector<64x128xf32> -> vector<64x128xf32>
    %c0_49 = arith.constant 0 : index
    %c0_50 = arith.constant 0 : index
    %43 = vector.load %arg5[%c0_49, %c0_50] : memref<64x128xf32, #tpu.memory_space<vmem>>, vector<64x128xf32>
    %44 = arith.addf %43, %42 : vector<64x128xf32>
    %c0_51 = arith.constant 0 : index
    %c0_52 = arith.constant 0 : index
    %45 = vector.load %arg5[%c0_51, %c0_52] : memref<64x128xf32, #tpu.memory_space<vmem>>, vector<64x128xf32>
    tpu.vector_store %arg5[%c0_51, %c0_52], %44 {strides = array<i32>} : memref<64x128xf32, #tpu.memory_space<vmem>>, vector<64x128xf32>,
    %c0_53 = arith.constant 0 : index
    %c16 = arith.constant 16 : index
    %c0_54 = arith.constant 0 : index
    %46 = vector.load %arg1[%c0_53, %c16, %c0_54] : memref<1x320x128xbf16, #tpu.memory_space<vmem>>, vector<1x64x128xbf16>
    %47 = vector.shape_cast %46 : vector<1x64x128xbf16> to vector<64x128xbf16>
    %c6 = arith.constant 6 : index
    %c0_55 = arith.constant 0 : index
    %c0_56 = arith.constant 0 : index
    %48 = vector.load %arg2[%c6, %c0_55, %c0_56] : memref<9x128x128xbf16, #tpu.memory_space<vmem>>, vector<1x128x128xbf16>
    %49 = vector.shape_cast %48 : vector<1x128x128xbf16> to vector<128x128xbf16>
    %cst_57 = arith.constant dense<0.000000e+00> : vector<64x128xf32>
    %50 = tpu.matmul %47, %49, %cst_57 {dimension_numbers = #tpu.dot_dimension_numbers<[1], [0], [0], [1], [0, 0, 1, 1], [], []>} : vector<64x128xbf16>, vector<128x128xbf16>, vector<64x128xf32> -> vector<64x128xf32>
    %c0_58 = arith.constant 0 : index
    %c0_59 = arith.constant 0 : index
    %51 = vector.load %arg5[%c0_58, %c0_59] : memref<64x128xf32, #tpu.memory_space<vmem>>, vector<64x128xf32>
    %52 = arith.addf %51, %50 : vector<64x128xf32>
    %c0_60 = arith.constant 0 : index
    %c0_61 = arith.constant 0 : index
    %53 = vector.load %arg5[%c0_60, %c0_61] : memref<64x128xf32, #tpu.memory_space<vmem>>, vector<64x128xf32>
    tpu.vector_store %arg5[%c0_60, %c0_61], %52 {strides = array<i32>} : memref<64x128xf32, #tpu.memory_space<vmem>>, vector<64x128xf32>,
    %c0_62 = arith.constant 0 : index
    %c96 = arith.constant 96 : index
    %c0_63 = arith.constant 0 : index
    %54 = vector.load %arg1[%c0_62, %c96, %c0_63] : memref<1x320x128xbf16, #tpu.memory_space<vmem>>, vector<1x64x128xbf16>
    %55 = vector.shape_cast %54 : vector<1x64x128xbf16> to vector<64x128xbf16>
    %c7 = arith.constant 7 : index
    %c0_64 = arith.constant 0 : index
    %c0_65 = arith.constant 0 : index
    %56 = vector.load %arg2[%c7, %c0_64, %c0_65] : memref<9x128x128xbf16, #tpu.memory_space<vmem>>, vector<1x128x128xbf16>
    %57 = vector.shape_cast %56 : vector<1x128x128xbf16> to vector<128x128xbf16>
    %cst_66 = arith.constant dense<0.000000e+00> : vector<64x128xf32>
    %58 = tpu.matmul %55, %57, %cst_66 {dimension_numbers = #tpu.dot_dimension_numbers<[1], [0], [0], [1], [0, 0, 1, 1], [], []>} : vector<64x128xbf16>, vector<128x128xbf16>, vector<64x128xf32> -> vector<64x128xf32>
    %c0_67 = arith.constant 0 : index
    %c0_68 = arith.constant 0 : index
    %59 = vector.load %arg5[%c0_67, %c0_68] : memref<64x128xf32, #tpu.memory_space<vmem>>, vector<64x128xf32>
    %60 = arith.addf %59, %58 : vector<64x128xf32>
    %c0_69 = arith.constant 0 : index
    %c0_70 = arith.constant 0 : index
    %61 = vector.load %arg5[%c0_69, %c0_70] : memref<64x128xf32, #tpu.memory_space<vmem>>, vector<64x128xf32>
    tpu.vector_store %arg5[%c0_69, %c0_70], %60 {strides = array<i32>} : memref<64x128xf32, #tpu.memory_space<vmem>>, vector<64x128xf32>,
    %c0_71 = arith.constant 0 : index
    %c17 = arith.constant 17 : index
    %c0_72 = arith.constant 0 : index
    %62 = vector.load %arg1[%c0_71, %c17, %c0_72] : memref<1x320x128xbf16, #tpu.memory_space<vmem>>, vector<1x64x128xbf16>
    %63 = vector.shape_cast %62 : vector<1x64x128xbf16> to vector<64x128xbf16>
    %c8 = arith.constant 8 : index
    %c0_73 = arith.constant 0 : index
    %c0_74 = arith.constant 0 : index
    %64 = vector.load %arg2[%c8, %c0_73, %c0_74] : memref<9x128x128xbf16, #tpu.memory_space<vmem>>, vector<1x128x128xbf16>
    %65 = vector.shape_cast %64 : vector<1x128x128xbf16> to vector<128x128xbf16>
    %cst_75 = arith.constant dense<0.000000e+00> : vector<64x128xf32>
    %66 = tpu.matmul %63, %65, %cst_75 {dimension_numbers = #tpu.dot_dimension_numbers<[1], [0], [0], [1], [0, 0, 1, 1], [], []>} : vector<64x128xbf16>, vector<128x128xbf16>, vector<64x128xf32> -> vector<64x128xf32>
    %c0_76 = arith.constant 0 : index
    %c0_77 = arith.constant 0 : index
    %67 = vector.load %arg5[%c0_76, %c0_77] : memref<64x128xf32, #tpu.memory_space<vmem>>, vector<64x128xf32>
    %68 = arith.addf %67, %66 : vector<64x128xf32>
    %c0_78 = arith.constant 0 : index
    %c0_79 = arith.constant 0 : index
    %69 = vector.load %arg5[%c0_78, %c0_79] : memref<64x128xf32, #tpu.memory_space<vmem>>, vector<64x128xf32>
    tpu.vector_store %arg5[%c0_78, %c0_79], %68 {strides = array<i32>} : memref<64x128xf32, #tpu.memory_space<vmem>>, vector<64x128xf32>,
    %c0_80 = arith.constant 0 : index
    %c0_81 = arith.constant 0 : index
    %70 = vector.load %arg5[%c0_80, %c0_81] : memref<64x128xf32, #tpu.memory_space<vmem>>, vector<64x128xf32>
    %c0_82 = arith.constant 0 : index
    %c0_83 = arith.constant 0 : index
    %71 = vector.load %arg3[%c0_82, %c0_83] : memref<1x128xf32, #tpu.memory_space<vmem>>, vector<1x128xf32>
    %72 = vector.broadcast %71 : vector<1x128xf32> to vector<64x128xf32>
    %73 = arith.addf %70, %72 : vector<64x128xf32>
    %74 = vector.shape_cast %73 : vector<64x128xf32> to vector<1x4x16x128xf32>
    %c0_84 = arith.constant 0 : index
    %c0_85 = arith.constant 0 : index
    %c0_86 = arith.constant 0 : index
    %c0_87 = arith.constant 0 : index
    %75 = vector.load %arg4[%c0_84, %c0_85, %c0_86, %c0_87] : memref<1x4x16x128xf32, #tpu.memory_space<vmem>>, vector<1x4x16x128xf32>
    tpu.vector_store %arg4[%c0_84, %c0_85, %c0_86, %c0_87], %74 {strides = array<i32>} : memref<1x4x16x128xf32, #tpu.memory_space<vmem>>, vector<1x4x16x128xf32>,
    return
  }
  func.func @transform_0(%arg0: i32) -> (i32, i32, i32) {
    %c0_i32 = arith.constant 0 : i32
    %c0_i32_0 = arith.constant 0 : i32
    %c0_i32_1 = arith.constant 0 : i32
    return %arg0, %c0_i32, %c0_i32_0 : i32, i32, i32
  }
  func.func @transform_1(%arg0: i32) -> (i32, i32, i32) {
    %c0_i32 = arith.constant 0 : i32
    %c0_i32_0 = arith.constant 0 : i32
    %c0_i32_1 = arith.constant 0 : i32
    %c0_i32_2 = arith.constant 0 : i32
    return %c0_i32, %c0_i32_0, %c0_i32_1 : i32, i32, i32
  }
  func.func @transform_2(%arg0: i32) -> (i32, i32) {
    %c0_i32 = arith.constant 0 : i32
    %c0_i32_0 = arith.constant 0 : i32
    %c0_i32_1 = arith.constant 0 : i32
    return %c0_i32, %c0_i32_0 : i32, i32
  }
  func.func @transform_3(%arg0: i32) -> (i32, i32, i32, i32) {
    %c0_i32 = arith.constant 0 : i32
    %c0_i32_0 = arith.constant 0 : i32
    %c0_i32_1 = arith.constant 0 : i32
    %c0_i32_2 = arith.constant 0 : i32
    return %arg0, %c0_i32, %c0_i32_0, %c0_i32_1 : i32, i32, i32, i32
  }
}

</mosaic_0001>

<bundles_post_ra>
// kernel: last_level_maxpool_v2.5
= control target key start
LH: loop header
LB: loop body
LE: loop exit
PB: predicated region body
PF: predicated region fallthrough
CT: control target
= control target key end

     0   :  { %s3996_s17 = smov 0   ;;  %s4375_s0 = inlined_call_operand.vmem [shape: bf16[2,576,128], index: 0, kind: input, shape index: {}]   ;;  %s4376_s1 = inlined_call_operand.vmem [shape: bf16[9,128,128], index: 1, kind: input, shape index: {}]   ;;  %s4377_s2 = inlined_call_operand.vmem [shape: f32[4], index: 2, kind: input, shape index: {}]   ;;  %s4378_s3 = inlined_call_operand.<no memory space> [shape: f32[], index: 3, kind: input, shape index: {}]   ;;  %s4379_s4 = inlined_call_operand.vmem [shape: f32[2,8,16,128], index: 4, kind: output, shape index: {}]  }
   0x1   :  { %v9_v0 = vstv %s4378_s3 }
   0x2 LB: > { %s2941_s18 = sadd.s32 4294967295, %s3966_s17   ;;  %p2945_p0 = scmp.ge.s32.totalorder %s3966_s17, 1  ;;  %s3966_s17 = sphi %s3996_s17, %s15_s17  }
   0x3   : > { %p139_p1 = scmp.lt.s32.totalorder %s3966_s17, 3 }
   0x5   : > { %p140_p2 = pnand %p2945_p0, %p139_p1 }
   0x7   : > { %143 = sbr.rel (%p140_p2) target bundleno = 404 (0x194), region = 32 }
   0xe   : > { %v3813_v1 = vld [vmem:[%s4376_s1] sm:$0xff]   ;;  %p163_p3 = scmp.lt.s32.totalorder %s2941_s18, 1  ;;  %v3815_v3 = vld [vmem:[%s4376_s1 + $0x8] sm:$0xff]   ;;  %v3817_v5 = vld [vmem:[%s4376_s1 + $0x10] sm:$0xff]   ;;  %vm773_vm0 = vsmask.f32 7424 }
   0xf   : > { %v3814_v2 = vld [vmem:[%s4376_s1 + $0x100] sm:$0xff]   ;;  %3372 = vmatprep.subr.bf16.mxu1 %v3813_v1  ;;  %v3816_v4 = vld [vmem:[%s4376_s1 + $0x108] sm:$0xff]   ;;  %v3818_v6 = vld [vmem:[%s4376_s1 + $0x110] sm:$0xff]  }
  0x10   : > { %3500 = vmatprep.subr.bf16.mxu0 %v3814_v2  ;;  %3373 = vmatpush3.bf16.msra.mxu1 %v3813_v1  ;;  %s4381_s18 = smov (!%p163_p3, %s2941_s18), 1  ;;  %v3819_v7 = vld [vmem:[%s4376_s1 + $0x18] sm:$0xff]   ;;  %v3821_v9 = vld [vmem:[%s4376_s1 + $0x20] sm:$0xff]   ;;  %v3823_v11 = vld [vmem:[%s4376_s1 + $0x28] sm:$0xff]  }
  0x11   : > { %3501 = vmatpush3.bf16.msra.mxu0 %v3814_v2  ;;  %3374 = vmatprep.subr.bf16.mxu1 %v3815_v3  ;;  %v3820_v8 = vld [vmem:[%s4376_s1 + $0x118] sm:$0xff]   ;;  %s3804_s9 = smul.u32 288, %s4381_s18  ;;  %v3822_v10 = vld [vmem:[%s4376_s1 + $0x120] sm:$0xff]   ;;  %v3824_v12 = vld [vmem:[%s4376_s1 + $0x128] sm:$0xff]   ;;  %s3227_s5 = sshll.u32 %s4381_s18, 7 }
  0x12   : > { %3502 = vmatprep.subr.bf16.mxu0 %v3816_v4  ;;  %v3825_v15 = vld [vmem:[%s4376_s1 + $0x30] sm:$0xff]   ;;  %v3827_v17 = vld [vmem:[%s4376_s1 + $0x38] sm:$0xff]   ;;  %v3832_v20 = vld [vmem:[%s4376_s1 + $0x40] sm:$0xff]   ;;  %s4350_s8 = scalar_lea.vmem %s4379_s4, %s3227_s5 }
  0x13   : > { %s4040_s16 = scalar_lea.vmem %s4375_s0, %s3804_s9  ;;  %v3826_v16 = vld [vmem:[%s4376_s1 + $0x130] sm:$0xff]   ;;  %v3828_v18 = vld [vmem:[%s4376_s1 + $0x138] sm:$0xff]   ;;  %v3834_v21 = vld [vmem:[%s4376_s1 + $0x140] sm:$0xff]  }
  0x14   : > { %3375 = vmatpush3.bf16.msra.mxu1 %v3815_v3  ;;  %v3829_v13 = vld [vmem:[%s4040_s16] sm:$0xff]   ;;  %v3830_v14 = vld [vmem:[%s4040_s16 + $0xd8] sm:$0xff]   ;;  %v3831_v19 = vld [vmem:[%s4040_s16 + $0x8] sm:$0xff]  }
  0x15   : > { %3503 = vmatpush3.bf16.msra.mxu0 %v3816_v4  ;;  %3376 = vmatprep.subr.bf16.mxu1 %v3817_v5  ;;  %v3833_v22 = vld [vmem:[%s4040_s16 + $0xe0] sm:$0xff]   ;;  %v3835_v23 = vld [vmem:[%s4376_s1 + $0x48] sm:$0xff]   ;;  %v3837_v25 = vld [vmem:[%s4040_s16 + $0x10] sm:$0xff]  }
  0x16   : > { %3504 = vmatprep.subr.bf16.mxu0 %v3818_v6  ;;  %3388 = vmatprep.mubr.bf16.mxu1 %v3829_v13  ;;  %v3836_v24 = vld [vmem:[%s4376_s1 + $0x148] sm:$0xff]   ;;  %v3839_v27 = vld [vmem:[%s4040_s16 + $0x18] sm:$0xff]   ;;  %v3840_v28 = vld [vmem:[%s4376_s1 + $0x50] sm:$0xff]  }
  0x17   : > { %3516 = vmatprep.mubr.bf16.mxu0 %v3830_v14  ;;  %v3838_v26 = vld [vmem:[%s4040_s16 + $0xe8] sm:$0xff]   ;;  %v3842_v29 = vld [vmem:[%s4376_s1 + $0x150] sm:$0xff]   ;;  %v3843_v31 = vld [vmem:[%s4376_s1 + $0x58] sm:$0xff]  }
  0x18   : > { %3377 = vmatpush3.bf16.msra.mxu1 %v3817_v5  ;;  %v3841_v30 = vld [vmem:[%s4040_s16 + $0xf0] sm:$0xff]   ;;  %v3844_v32 = vld [vmem:[%s4376_s1 + $0x158] sm:$0xff]   ;;  %v3845_v33 = vld [vmem:[%s4040_s16 + $0x20] sm:$0xff]  }
  0x19   : > { %3505 = vmatpush3.bf16.msra.mxu0 %v3818_v6  ;;  %3378 = vmatprep.subr.bf16.mxu1 %v3819_v7  ;;  %v3846_v34 = vld [vmem:[%s4040_s16 + $0xf8] sm:$0xff]   ;;  %v3847_v35 = vld [vmem:[%s4040_s16 + $0x28] sm:$0xff]   ;;  %v3848_v36 = vld [vmem:[%s4376_s1 + $0x60] sm:$0xff]  }
  0x1a   : > { %3506 = vmatprep.subr.bf16.mxu0 %v3820_v8  ;;  %v3849_v37 = vld [vmem:[%s4040_s16 + $0x100] sm:$0xff]   ;;  %v3851_v39 = vld [vmem:[%s4376_s1 + $0x68] sm:$0xff]   ;;  %v3853_v41 = vld [vmem:[%s4040_s16 + $0x30] sm:$0xff]  }
  0x1b   : > { %v3850_v38 = vld [vmem:[%s4376_s1 + $0x160] sm:$0xff]   ;;  %v3852_v40 = vld [vmem:[%s4376_s1 + $0x168] sm:$0xff]   ;;  %v3856_v43 = vld [vmem:[%s4376_s1 + $0x70] sm:$0xff]  }
  0x1c   : > { %3379 = vmatpush3.bf16.msra.mxu1 %v3819_v7  ;;  %v3854_v42 = vld [vmem:[%s4040_s16 + $0x108] sm:$0xff]   ;;  %v3862_v44 = vld [vmem:[%s4040_s16 + $0x90] sm:$0xff]   ;;  %v3863_v45 = vld [vmem:[%s4040_s16 + $0x98] sm:$0xff]  }
  0x1d   : > { %3507 = vmatpush3.bf16.msra.mxu0 %v3820_v8  ;;  %3380 = vmatprep.subr.bf16.mxu1 %v3821_v9  ;;  %v3855_v46 = vld [vmem:[%s4040_s16 + $0x38] sm:$0xff]   ;;  %v1669_v47 = vshrl.u32 %v3862_v44, 16  ;;  %v1671_v48 = vshll.u32 %v3862_v44, 16  ;;  %v3857_v49 = vld [vmem:[%s4040_s16 + $0x110] sm:$0xff]   ;;  %v1676_v51 = vshll.u32 %v3863_v45, 16  ;;  %v3866_v54 = vld [vmem:[%s4040_s16 + $0xa0] sm:$0xff]  }
  0x1e   : > { %3508 = vmatprep.subr.bf16.mxu0 %v3822_v10  ;;  %v3858_v50 = vld [vmem:[%s4376_s1 + $0x170] sm:$0xff]   ;;  %v3859_v52 = vld [vmem:[%s4376_s1 + $0x78] sm:$0xff]   ;;  %v1680_v58 = vshrl.u32 %v3863_v45, 16  ;;  %v1684_v59 = vshll.u32 %v3866_v54, 16  ;;  %v3861_v60 = vld [vmem:[%s4040_s16 + $0x48] sm:$0xff]   ;;  %v1688_v63 = vshrl.u32 %v3866_v54, 16 }
  0x1f   : > { %v1673_v53 = vrot.slane %v1671_v48, 1  ;;  %v3860_v55 = vld [vmem:[%s4376_s1 + $0x178] sm:$0xff]   ;;  %v1678_v56 = vrot.slane %v1676_v51, 1  ;;  %v3871_v62 = vld [vmem:[%s4040_s16 + $0xa8] sm:$0xff]   ;;  %v3864_v2 = vld [vmem:[%s4040_s16 + $0x50] sm:$0xff]  }
  0x20   : > { %3381 = vmatpush3.bf16.msra.mxu1 %v3821_v9  ;;  %v3865_v3 = vld [vmem:[%s4376_s1 + $0x80] sm:$0xff]   ;;  %v1686_v4 = vrot.slane %v1684_v59, 1  ;;  %v1692_v6 = vshll.u32 %v3871_v62, 16  ;;  %v3868_v7 = vld [vmem:[%s4376_s1 + $0x88] sm:$0xff]   ;;  %v3874_v8 = vld [vmem:[%s4040_s16 + $0xb0] sm:$0xff]   ;;  %v1696_v13 = vshrl.u32 %v3871_v62, 16 }
  0x21   : > { %3509 = vmatpush3.bf16.msra.mxu0 %v3822_v10  ;;  %3382 = vmatprep.subr.bf16.mxu1 %v3823_v11  ;;  %v1674_v57 = vor.u32 %v1673_v53, %v1669_v47  ;;  %v1682_v1 = vor.u32 %v1680_v58, %v1678_v56  ;;  %v3867_v5 = vld [vmem:[%s4376_s1 + $0x180] sm:$0xff]   ;;  %v3869_v9 = vld [vmem:[%s4376_s1 + $0x188] sm:$0xff]   ;;  %v1700_v14 = vshll.u32 %v3874_v8, 16  ;;  %v3890_v44 = vld [vmem:[%s4040_s16 + $0xd0] ss:$0 sps:$4 sm:$0x11]  }
  0x22   : > { %3510 = vmatprep.subr.bf16.mxu0 %v3824_v12  ;;  %v1690_v10 = vor.u32 %v1688_v63, %v1686_v4  ;;  %v3885_v45 = vld [vmem:[%s4376_s1 + $0x1a8] sm:$0xff]   ;;  %v3886_v51 = vld [vmem:[%s4040_s16 + $0x78] sm:$0xff]   ;;  %v3894_v53 = vld [vmem:[%s4040_s16] sm:$0xff]  }
  0x23   : > { %v1679_v61 = vsel %vm773_vm0, %v1674_v57, %v1678_v56  ;;  %v3888_v56 = vld [vmem:[%s4040_s16 + $0x80] sm:$0xff]   ;;  %v775_v59 = vshrl.u32 %v3894_v53, 16  ;;  %v3891_v62 = vld [vmem:[%s4376_s1 + $0x1b0] sm:$0xff]  }
  0x24   : > { %3383 = vmatpush3.bf16.msra.mxu1 %v3823_v11  ;;  %v1694_v11 = vrot.slane %v1692_v6, 1  ;;  %v3892_v6 = vld [vmem:[%s4376_s1 + $0xb8] sm:$0xff]  }
  0x25   : > { %3511 = vmatpush3.bf16.msra.mxu0 %v3824_v12  ;;  %3384 = vmatprep.subr.bf16.mxu1 %v3825_v15  ;;  %v1687_v12 = vsel %vm773_vm0, %v1682_v1, %v1686_v4 }
  0x26   : > { %3512 = vmatprep.subr.bf16.mxu0 %v3826_v16 }
  0x28   : > { %3385 = vmatpush3.bf16.msra.mxu1 %v3825_v15  ;;  %v3870_v15 = vld [vmem:[%s4040_s16 + $0x58] sm:$0xff]  }
  0x29   : > { %3513 = vmatpush3.bf16.msra.mxu0 %v3826_v16  ;;  %3386 = vmatprep.subr.bf16.mxu1 %v3827_v17  ;;  %v1695_v16 = vsel %vm773_vm0, %v1690_v10, %v1694_v11  ;;  %v3896_v10 = vld [vmem:[%s4040_s16 + $0x8] sm:$0xff]  }
  0x2a   : > { %3514 = vmatprep.subr.bf16.mxu0 %v3828_v18 }
  0x2c   : > { %3387 = vmatpush3.bf16.msra.mxu1 %v3827_v17  ;;  %v3879_v17 = vld [vmem:[%s4040_s16 + $0xb8] sm:$0xff]  }
  0x2d   : > { %3515 = vmatpush3.bf16.msra.mxu0 %v3828_v18  ;;  %3404 = vmatprep.subr.bf16.mxu1 %v3832_v20  ;;  %v1704_v18 = vshrl.u32 %v3874_v8, 16  ;;  %v3893_v8 = vld [vmem:[%s4376_s1 + $0x1b8] sm:$0xff]  }
  0x2e   : > { %3532 = vmatprep.subr.bf16.mxu0 %v3834_v21 }
  0x2f   : > { %3389 = vmatmul.mubr.bf16.vlgmr.msra.gmra.mrb[0].mxu1 %v3831_v19  ;;  %v3872_v19 = vld [vmem:[%s4040_s16 + $0x60] sm:$0xff]  }
  0x30   : > { %3517 = vmatmul.mubr.bf16.vlgmr.msra.gmra.mrb[0].mxu0 %v3833_v22  ;;  %3405 = vmatpush3.bf16.msra.mxu1 %v3832_v20  ;;  %v3873_v20 = vld [vmem:[%s4376_s1 + $0x90] sm:$0xff]   ;;  %v1702_v22 = vrot.slane %v1700_v14, 1  ;;  %v3898_v14 = vld [vmem:[%s4376_s1 + $0xc0] sm:$0xff]  }
  0x31   : > { %3533 = vmatpush3.bf16.msra.mxu0 %v3834_v21  ;;  %3406 = vmatprep.subr.bf16.mxu1 %v3835_v23  ;;  %v1698_v21 = vor.u32 %v1696_v13, %v1694_v11 }
  0x32   : > { %3534 = vmatprep.subr.bf16.mxu0 %v3836_v24  ;;  %3392 = vmatprep.mubr.bf16.mxu1 %v3837_v25  ;;  %v3876_v25 = vld [vmem:[%s4376_s1 + $0x98] sm:$0xff]  }
  0x33   : > { %3520 = vmatprep.mubr.bf16.mxu0 %v3838_v26  ;;  %v3882_v26 = vld [vmem:[%s4040_s16 + $0xc0] sm:$0xff]  }
  0x34   : > { %3407 = vmatpush3.bf16.msra.mxu1 %v3835_v23  ;;  %v3875_v23 = vld [vmem:[%s4376_s1 + $0x190] sm:$0xff]  }
  0x35   : > { %3535 = vmatpush3.bf16.msra.mxu0 %v3836_v24  ;;  %3408 = vmatprep.subr.bf16.mxu1 %v3840_v28  ;;  %v1708_v24 = vshll.u32 %v3879_v17, 16 }
  0x36   : > { %3536 = vmatprep.subr.bf16.mxu0 %v3842_v29 }
  0x37   : > { %3393 = vmatmul.mubr.bf16.gmra.mrb[4].mxu1 %v3839_v27  ;;  %v3877_v27 = vld [vmem:[%s4376_s1 + $0x198] sm:$0xff]  }
  0x38   : > { %3521 = vmatmul.mubr.bf16.gmra.mrb[4].mxu0 %v3841_v30  ;;  %3409 = vmatpush3.bf16.msra.mxu1 %v3840_v28  ;;  %v1706_v28 = vor.u32 %v1704_v18, %v1702_v22  ;;  %v1703_v30 = vsel %vm773_vm0, %v1698_v21, %v1702_v22  ;;  %v3901_v18 = vld [vmem:[%s4376_s1 + $0xc8] sm:$0xff]   ;;  %v3905_v21 = vld [vmem:[%s4040_s16 + $0x20] sm:$0xff]  }
  0x39   : > { %3537 = vmatpush3.bf16.msra.mxu0 %v3842_v29  ;;  %3410 = vmatprep.subr.bf16.mxu1 %v3843_v31  ;;  %v1710_v29 = vrot.slane %v1708_v24, 1  ;;  %v3902_v24 = vld [vmem:[%s4376_s1 + $0x1c8] sm:$0xff]  }
  0x3a   : > { %3538 = vmatprep.subr.bf16.mxu0 %v3844_v32  ;;  %3396 = vmatprep.mubr.bf16.mxu1 %v3845_v33  ;;  %v3878_v33 = vld [vmem:[%s4040_s16 + $0x68] sm:$0xff]  }
  0x3b   : > { %3524 = vmatprep.mubr.bf16.mxu0 %v3846_v34  ;;  %v1711_v34 = vsel %vm773_vm0, %v1706_v28, %v1710_v29 }
  0x3c   : > { %3411 = vmatpush3.bf16.msra.mxu1 %v3843_v31  ;;  %v1712_v31 = vshrl.u32 %v3879_v17, 16  ;;  %v3900_v17 = vld [vmem:[%s4376_s1 + $0x1c0] sm:$0xff]  }
  0x3d   : > { %3539 = vmatpush3.bf16.msra.mxu0 %v3844_v32  ;;  %3412 = vmatprep.subr.bf16.mxu1 %v3848_v36  ;;  %v1716_v32 = vshll.u32 %v3882_v26, 16 }
  0x3e   : > { %3540 = vmatprep.subr.bf16.mxu0 %v3850_v38 }
  0x3f   : > { %3397 = vmatmul.mubr.bf16.gmra.mrb[8].mxu1 %v3847_v35  ;;  %v3887_v35 = vld [vmem:[%s4040_s16 + $0xc8] sm:$0xff]  }
  0x40   : > { %3525 = vmatmul.mubr.bf16.gmra.mrb[8].mxu0 %v3849_v37  ;;  %3413 = vmatpush3.bf16.msra.mxu1 %v3848_v36  ;;  %v1720_v36 = vshrl.u32 %v3882_v26, 16  ;;  %v3880_v37 = vld [vmem:[%s4040_s16 + $0x70] sm:$0xff]   ;;  %v3904_v26 = vld [vmem:[%s4040_s16 + $0x18] sm:$0xff]  }
  0x41   : > { %3541 = vmatpush3.bf16.msra.mxu0 %v3850_v38  ;;  %3414 = vmatprep.subr.bf16.mxu1 %v3851_v39  ;;  %v3881_v38 = vld [vmem:[%s4376_s1 + $0xa0] sm:$0xff]  }
  0x42   : > { %3542 = vmatprep.subr.bf16.mxu0 %v3852_v40  ;;  %3400 = vmatprep.mubr.bf16.mxu1 %v3853_v41  ;;  %v3883_v41 = vld [vmem:[%s4376_s1 + $0x1a0] sm:$0xff]  }
  0x43   : > { %3528 = vmatprep.mubr.bf16.mxu0 %v3854_v42  ;;  %v1724_v42 = vshll.u32 %v3887_v35, 16 }
  0x44   : > { %3415 = vmatpush3.bf16.msra.mxu1 %v3851_v39  ;;  %v1714_v39 = vor.u32 %v1712_v31, %v1710_v29  ;;  %v3906_v29 = vld [vmem:[%s4376_s1 + $0xd0] sm:$0xff]  }
  0x45   : > { %3543 = vmatpush3.bf16.msra.mxu0 %v3852_v40  ;;  %3416 = vmatprep.subr.bf16.mxu1 %v3856_v43  ;;  %v1718_v40 = vrot.slane %v1716_v32, 1  ;;  %v1726_v47 = vrot.slane %v1724_v42, 1  ;;  %v810_v32 = vshrl.u32 %v3905_v21, 16  ;;  %v3910_v42 = vld [vmem:[%s4376_s1 + $0x1d8] sm:$0xff]  }
  0x46   : > { %3544 = vmatprep.subr.bf16.mxu0 %v3858_v50 }
  0x47   : > { %3401 = vmatmul.mubr.bf16.gmra.mrb[12].mxu1 %v3855_v46  ;;  %v1722_v46 = vor.u32 %v1720_v36, %v1718_v40  ;;  %v1719_v48 = vsel %vm773_vm0, %v1714_v39, %v1718_v40  ;;  %v3909_v36 = vld [vmem:[%s4376_s1 + $0xd8] sm:$0xff]   ;;  %v3913_v39 = vld [vmem:[%s4040_s16 + $0x30] sm:$0xff]  }
  0x48   : > { %3529 = vmatmul.mubr.bf16.gmra.mrb[12].mxu0 %v3857_v49  ;;  %3417 = vmatpush3.bf16.msra.mxu1 %v3856_v43  ;;  %v3884_v43 = vld [vmem:[%s4376_s1 + $0xa8] sm:$0xff]   ;;  %v1728_v49 = vshrl.u32 %v3887_v35, 16  ;;  %v3908_v35 = vld [vmem:[%s4376_s1 + $0x1d0] sm:$0xff]  }
  0x49   : > { %3545 = vmatpush3.bf16.msra.mxu0 %v3858_v50  ;;  %3418 = vmatprep.subr.bf16.mxu1 %v3859_v52  ;;  %v1732_v50 = vshll.u32 %v3890_v44, 16  ;;  %v1727_v54 = vsel %vm773_vm0, %v1722_v46, %v1726_v47  ;;  %v3912_v44 = vld [vmem:[%s4040_s16 + $0x28] sm:$0xff]  }
  0x4a   : > { %3546 = vmatprep.subr.bf16.mxu0 %v3860_v55  ;;  %3420 = vmatprep.mubr.bf16.mxu1 %v3861_v60  ;;  %v1730_v57 = vor.u32 %v1728_v49, %v1726_v47  ;;  %v777_v60 = vshll.u32 %v3894_v53, 16  ;;  %v3914_v47 = vld [vmem:[%s4376_s1 + $0xe0] sm:$0xff]  }
  0x4b   : > { %3548 = vmatprep.mubr.bf16.mxu0 %v1679_v61  ;;  %v1734_v58 = vrot.slane %v1732_v50, 1  ;;  %v3897_v61 = vld [vmem:[%s4040_s16 + $0x10] sm:$0xff]   ;;  %v826_v50 = vshrl.u32 %v3913_v39, 16  ;;  %v3921_v53 = vld [vmem:[%s4040_s16 + $0x40] ss:$0 sps:$4 sm:$0x11]  }
  0x4c   : > { %3419 = vmatpush3.bf16.msra.mxu1 %v3859_v52  ;;  %v3889_v52 = vld [vmem:[%s4376_s1 + $0xb0] sm:$0xff]   ;;  %v779_v1 = vrot.slane %v777_v60, 1  ;;  %v790_v4 = vshll.u32 %v3897_v61, 16  ;;  %v794_v11 = vshrl.u32 %v3897_v61, 16  ;;  %v3917_v60 = vld [vmem:[%s4376_s1 + $0xe8] sm:$0xff]  }
  0x4d   : > { %3547 = vmatpush3.bf16.msra.mxu0 %v3860_v55  ;;  %3436 = vmatprep.subr.bf16.mxu1 %v3865_v3  ;;  %v3895_v55 = vld [vmem:[%s4040_s16 + $0x8] sm:$0xff]  }
  0x4e   : > { %3564 = vmatprep.subr.bf16.mxu0 %v3867_v5  ;;  %v782_v63 = vshll.u32 %v3895_v55, 16  ;;  %v792_v13 = vrot.slane %v790_v4, 1  ;;  %v3922_v4 = vld [vmem:[%s4376_s1 + $0xf0] sm:$0xff]  }
  0x4f   : > { %3421 = vmatmul.mubr.bf16.vlgmr.msra.gmra.mrb[0].mxu1 %v3864_v2  ;;  %v786_v2 = vshrl.u32 %v3895_v55, 16 }
  0x50   : > { %3549 = vmatmul.mubr.bf16.vlgmr.msra.gmra.mrb[0].mxu0 %v1687_v12  ;;  %3437 = vmatpush3.bf16.msra.mxu1 %v3865_v3  ;;  %v784_v3 = vrot.slane %v782_v63, 1 }
  0x51   : > { %3565 = vmatpush3.bf16.msra.mxu0 %v3867_v5  ;;  %3438 = vmatprep.subr.bf16.mxu1 %v3868_v7  ;;  %v1735_v5 = vsel %vm773_vm0, %v1730_v57, %v1734_v58 }
  0x52   : > { %3566 = vmatprep.subr.bf16.mxu0 %v3869_v9  ;;  %3424 = vmatprep.mubr.bf16.mxu1 %v3870_v15  ;;  %v788_v12 = vor.u32 %v786_v2, %v784_v3  ;;  %v3903_v15 = vld [vmem:[%s4040_s16 + $0x18] sm:$0xff]  }
  0x53   : > { %3552 = vmatprep.mubr.bf16.mxu0 %v1695_v16  ;;  %v3899_v16 = vld [vmem:[%s4040_s16 + $0x10] sm:$0xff]   ;;  %v802_v22 = vshrl.u32 %v3903_v15, 16 }
  0x54   : > { %3439 = vmatpush3.bf16.msra.mxu1 %v3868_v7  ;;  %v780_v7 = vor.u32 %v779_v1, %v775_v59  ;;  %v838_v59 = vshll.u32 %v3921_v53, 16  ;;  %v3920_v1 = vld [vmem:[%s4040_s16 + $0x38] sm:$0xff]  }
  0x55   : > { %3567 = vmatpush3.bf16.msra.mxu0 %v3869_v9  ;;  %3440 = vmatprep.subr.bf16.mxu1 %v3873_v20 }
  0x56   : > { %3568 = vmatprep.subr.bf16.mxu0 %v3875_v23  ;;  %v785_v9 = vsel %vm773_vm0, %v780_v7, %v784_v3  ;;  %v840_v3 = vrot.slane %v838_v59, 1 }
  0x57   : > { %3425 = vmatmul.mubr.bf16.gmra.mrb[4].mxu1 %v3872_v19  ;;  %v796_v19 = vor.u32 %v794_v11, %v792_v13  ;;  %v3928_v11 = vld [vmem:[%s4040_s16 + $0x50] sm:$0xff]  }
  0x58   : > { %3553 = vmatmul.mubr.bf16.gmra.mrb[4].mxu0 %v1703_v30  ;;  %3441 = vmatpush3.bf16.msra.mxu1 %v3873_v20  ;;  %v798_v20 = vshll.u32 %v3903_v15, 16  ;;  %v3932_v15 = vld [vmem:[%s4376_s1 + $0x208] sm:$0xff]  }
  0x59   : > { %3569 = vmatpush3.bf16.msra.mxu0 %v3875_v23  ;;  %3442 = vmatprep.subr.bf16.mxu1 %v3876_v25  ;;  %v793_v23 = vsel %vm773_vm0, %v788_v12, %v792_v13  ;;  %v3931_v12 = vld [vmem:[%s4376_s1 + $0x200] sm:$0xff]   ;;  %v3929_v13 = vld [vmem:[%s4040_s16 + $0x98] sm:$0xff]  }
  0x5a   : > { %3570 = vmatprep.subr.bf16.mxu0 %v3877_v27  ;;  %3428 = vmatprep.mubr.bf16.mxu1 %v3878_v33  ;;  %v3911_v33 = vld [vmem:[%s4040_s16 + $0x28] sm:$0xff]  }
  0x5b   : > { %3556 = vmatprep.mubr.bf16.mxu0 %v1711_v34  ;;  %v3907_v34 = vld [vmem:[%s4040_s16 + $0x20] sm:$0xff]   ;;  %v818_v40 = vshrl.u32 %v3911_v33, 16 }
  0x5c   : > { %3443 = vmatpush3.bf16.msra.mxu1 %v3876_v25  ;;  %v800_v25 = vrot.slane %v798_v20, 1  ;;  %v3936_v20 = vld [vmem:[%s4040_s16 + $0x68] sm:$0xff]  }
  0x5d   : > { %3571 = vmatpush3.bf16.msra.mxu0 %v3877_v27  ;;  %3444 = vmatprep.subr.bf16.mxu1 %v3881_v38  ;;  %v806_v27 = vshll.u32 %v3905_v21, 16  ;;  %v3938_v21 = vld [vmem:[%s4376_s1 + $0x218] sm:$0xff]  }
  0x5e   : > { %3572 = vmatprep.subr.bf16.mxu0 %v3883_v41  ;;  %v801_v28 = vsel %vm773_vm0, %v796_v19, %v800_v25  ;;  %v804_v30 = vor.u32 %v802_v22, %v800_v25  ;;  %v3935_v19 = vld [vmem:[%s4040_s16 + $0xa8] sm:$0xff]   ;;  %v3939_v22 = vld [vmem:[%s4040_s16 + $0xb0] sm:$0xff]   ;;  %v3941_v25 = vld [vmem:[%s4040_s16 + $0xb8] sm:$0xff]  }
  0x5f   : > { %3429 = vmatmul.mubr.bf16.gmra.mrb[8].mxu1 %v3880_v37  ;;  %v808_v31 = vrot.slane %v806_v27, 1  ;;  %v3942_v27 = vld [vmem:[%s4040_s16 + $0x78] sm:$0xff]  }
  0x60   : > { %3557 = vmatmul.mubr.bf16.gmra.mrb[8].mxu0 %v1719_v48  ;;  %3445 = vmatpush3.bf16.msra.mxu1 %v3881_v38  ;;  %v814_v38 = vshll.u32 %v3911_v33, 16  ;;  %v3945_v33 = vld [vmem:[%s4040_s16 + $0xc0] sm:$0xff]  }
  0x61   : > { %3573 = vmatpush3.bf16.msra.mxu0 %v3883_v41  ;;  %3446 = vmatprep.subr.bf16.mxu1 %v3884_v43  ;;  %v812_v37 = vor.u32 %v810_v32, %v808_v31  ;;  %v809_v41 = vsel %vm773_vm0, %v804_v30, %v808_v31  ;;  %v3953_v30 = vld [vmem:[%s4040_s16 + $0x28] sm:$0xff]   ;;  %v3954_v31 = vld [vmem:[%s4040_s16 + $0x30] sm:$0xff]  }
  0x62   : > { %3574 = vmatprep.subr.bf16.mxu0 %v3885_v45  ;;  %3432 = vmatprep.mubr.bf16.mxu1 %v3886_v51  ;;  %v3919_v51 = vld [vmem:[%s4040_s16 + $0x38] sm:$0xff]   ;;  %v3944_v32 = vld [vmem:[%s4376_s1 + $0x228] sm:$0xff]  }
  0x63   : > { %3560 = vmatprep.mubr.bf16.mxu0 %v1727_v54  ;;  %v3915_v54 = vld [vmem:[%s4040_s16 + $0x30] sm:$0xff]   ;;  %v834_v58 = vshrl.u32 %v3919_v51, 16 }
  0x64   : > { %3447 = vmatpush3.bf16.msra.mxu1 %v3884_v43  ;;  %v816_v43 = vrot.slane %v814_v38, 1 }
  0x65   : > { %3575 = vmatpush3.bf16.msra.mxu0 %v3885_v45  ;;  %3448 = vmatprep.subr.bf16.mxu1 %v3889_v52  ;;  %v822_v45 = vshll.u32 %v3913_v39, 16  ;;  %v3956_v39 = vld [vmem:[%s4040_s16 + $0x38] sm:$0xff]  }
  0x66   : > { %3576 = vmatprep.subr.bf16.mxu0 %v3891_v62  ;;  %v817_v46 = vsel %vm773_vm0, %v812_v37, %v816_v43  ;;  %v820_v48 = vor.u32 %v818_v40, %v816_v43  ;;  %v3955_v43 = vld [vmem:[%s4040_s16 + $0x18] sm:$0xff]  }
  0x67   : > { %3433 = vmatmul.mubr.bf16.gmra.mrb[12].mxu1 %v3888_v56  ;;  %v824_v49 = vrot.slane %v822_v45, 1  ;;  %v830_v56 = vshll.u32 %v3919_v51, 16  ;;  %v3958_v45 = vld [vmem:[%s4040_s16 + $0x40] sm:$0xff]   ;;  %v3948_v51 = vld [vmem:[%s4040_s16 + $0x88] sm:$0xff]  }
  0x68   : > { %3561 = vmatmul.mubr.bf16.gmra.mrb[12].mxu0 %v1735_v5  ;;  %3449 = vmatpush3.bf16.msra.mxu1 %v3889_v52  ;;  %v3916_v52 = vld [vmem:[%s4376_s1 + $0x1e0] sm:$0xff]   ;;  %v3924_v5 = vld [vmem:[%s4376_s1 + $0x1f0] sm:$0xff]   ;;  %v2618_v59 = vshll.u32 %v3958_v45, 16 }
  0x69   : > { %3577 = vmatpush3.bf16.msra.mxu0 %v3891_v62  ;;  %3450 = vmatprep.subr.bf16.mxu1 %v3892_v6  ;;  %v828_v55 = vor.u32 %v826_v50, %v824_v49  ;;  %v825_v57 = vsel %vm773_vm0, %v820_v48, %v824_v49  ;;  %v832_v61 = vrot.slane %v830_v56, 1  ;;  %v3918_v62 = vld [vmem:[%s4376_s1 + $0x1e8] sm:$0xff]   ;;  %v2610_v50 = vshll.u32 %v3956_v39, 16  ;;  %v3950_v56 = vld [vmem:[%s4376_s1 + $0x238] sm:$0xff]  }
  0x6a   : > { %3578 = vmatprep.subr.bf16.mxu0 %v3893_v8  ;;  %3452 = vmatprep.mubr.bf16.mxu1 %v785_v9  ;;  %v3926_v9 = vld [vmem:[%s4376_s1 + $0x1f8] sm:$0xff]  }
  0x6b   : > { %3580 = vmatprep.mubr.bf16.mxu0 %v3896_v10  ;;  %v833_v63 = vsel %vm773_vm0, %v828_v55, %v832_v61  ;;  %v836_v2 = vor.u32 %v834_v58, %v832_v61  ;;  %v3927_v10 = vld [vmem:[%s4040_s16 + $0x90] sm:$0xff]   ;;  %v2578_v55 = vshll.u32 %v3955_v43, 16  ;;  %v2614_v58 = vshrl.u32 %v3956_v39, 16 }
  0x6c   : > { %3451 = vmatpush3.bf16.msra.mxu1 %v3892_v6  ;;  %v3923_v6 = vld [vmem:[%s4040_s16 + $0x40] sm:$0xff]  }
  0x6d   : > { %3579 = vmatpush3.bf16.msra.mxu0 %v3893_v8  ;;  %3468 = vmatprep.subr.bf16.mxu1 %v3898_v14  ;;  %v841_v7 = vsel %vm773_vm0, %v836_v2, %v840_v3  ;;  %v3925_v8 = vld [vmem:[%s4376_s1 + $0xf8] sm:$0xff]   ;;  %v2580_v3 = vrot.slane %v2578_v55, 1 }
  0x6e   : > { %3596 = vmatprep.subr.bf16.mxu0 %v3900_v17 }
  0x6f   : > { %3453 = vmatmul.mubr.bf16.vlgmr.msra.gmra.mrb[0].mxu1 %v793_v23  ;;  %v3940_v23 = vld [vmem:[%s4040_s16 + $0x70] sm:$0xff]  }
  0x70   : > { %3581 = vmatmul.mubr.bf16.vlgmr.msra.gmra.mrb[0].mxu0 %v3899_v16  ;;  %3469 = vmatpush3.bf16.msra.mxu1 %v3898_v14  ;;  %v3930_v14 = vld [vmem:[%s4040_s16 + $0x58] sm:$0xff]   ;;  %v3933_v16 = vld [vmem:[%s4040_s16 + $0xa0] sm:$0xff]  }
  0x71   : > { %3597 = vmatpush3.bf16.msra.mxu0 %v3900_v17  ;;  %3470 = vmatprep.subr.bf16.mxu1 %v3901_v18  ;;  %v3934_v17 = vld [vmem:[%s4040_s16 + $0x60] sm:$0xff]  }
  0x72   : > { %3598 = vmatprep.subr.bf16.mxu0 %v3902_v24  ;;  %3456 = vmatprep.mubr.bf16.mxu1 %v801_v28  ;;  %v3952_v28 = vld [vmem:[%s4040_s16 + $0x10] sm:$0xff]  }
  0x73   : > { %3584 = vmatprep.mubr.bf16.mxu0 %v3904_v26  ;;  %v3951_v26 = vld [vmem:[%s4040_s16 + $0x8] sm:$0xff]   ;;  %v2570_v38 = vshll.u32 %v3952_v28, 16 }
  0x74   : > { %3471 = vmatpush3.bf16.msra.mxu1 %v3901_v18  ;;  %v3937_v18 = vld [vmem:[%s4376_s1 + $0x210] sm:$0xff]  }
  0x75   : > { %3599 = vmatpush3.bf16.msra.mxu0 %v3902_v24  ;;  %3472 = vmatprep.subr.bf16.mxu1 %v3906_v29  ;;  %v3943_v24 = vld [vmem:[%s4376_s1 + $0x220] sm:$0xff]   ;;  %v2572_v49 = vrot.slane %v2570_v38, 1 }
  0x76   : > { %3600 = vmatprep.subr.bf16.mxu0 %v3908_v35 }
  0x77   : > { %3457 = vmatmul.mubr.bf16.gmra.mrb[4].mxu1 %v809_v41  ;;  %v2598_v41 = vshrl.u32 %v3953_v30, 16 }
  0x78   : > { %3585 = vmatmul.mubr.bf16.gmra.mrb[4].mxu0 %v3907_v34  ;;  %3473 = vmatpush3.bf16.msra.mxu1 %v3906_v29  ;;  %v2565_v29 = vshll.u32 %v3951_v26, 16  ;;  %v3946_v34 = vld [vmem:[%s4040_s16 + $0x80] sm:$0xff]  }
  0x79   : > { %3601 = vmatpush3.bf16.msra.mxu0 %v3908_v35  ;;  %3474 = vmatprep.subr.bf16.mxu1 %v3909_v36  ;;  %v2594_v35 = vshll.u32 %v3953_v30, 16 }
  0x7a   : > { %3602 = vmatprep.subr.bf16.mxu0 %v3910_v42  ;;  %3460 = vmatprep.mubr.bf16.mxu1 %v817_v46  ;;  %v2567_v37 = vrot.slane %v2565_v29, 1  ;;  %v3957_v46 = vld [vmem:[%s4040_s16 + $0x20] sm:$0xff]  }
  0x7b   : > { %3588 = vmatprep.mubr.bf16.mxu0 %v3912_v44  ;;  %v4307_v40 = vrot.slane %v2594_v35, 1  ;;  %v3949_v44 = vld [vmem:[%s4376_s1 + $0x230] sm:$0xff]   ;;  %v2586_v61 = vshll.u32 %v3957_v46, 16 }
  0x7c   : > { %3475 = vmatpush3.bf16.msra.mxu1 %v3909_v36  ;;  %v2563_v36 = vshrl.u32 %v3951_v26, 16 }
  0x7d   : > { %3603 = vmatpush3.bf16.msra.mxu0 %v3910_v42  ;;  %3476 = vmatprep.subr.bf16.mxu1 %v3914_v47  ;;  %v2602_v42 = vshll.u32 %v3954_v31, 16 }
  0x7e   : > { %3604 = vmatprep.subr.bf16.mxu0 %v3916_v52  ;;  %v2568_v48 = vor.u32 %v2567_v37, %v2563_v36 }
  0x7f   : > { %3461 = vmatmul.mubr.bf16.gmra.mrb[8].mxu1 %v825_v57  ;;  %v2604_v53 = vrot.slane %v2602_v42, 1  ;;  %v2574_v57 = vshrl.u32 %v3952_v28, 16 }
  0x80   : > { %3589 = vmatmul.mubr.bf16.gmra.mrb[8].mxu0 %v3915_v54  ;;  %3477 = vmatpush3.bf16.msra.mxu1 %v3914_v47  ;;  %v3947_v47 = vld [vmem:[%s4040_s16 + $0xc8] sm:$0xff]   ;;  %v2606_v54 = vshrl.u32 %v3954_v31, 16 }
  0x81   : > { %3605 = vmatpush3.bf16.msra.mxu0 %v3916_v52  ;;  %3478 = vmatprep.subr.bf16.mxu1 %v3917_v60  ;;  %v2600_v52 = vor.u32 %v2598_v41, %v4307_v40 }
  0x82   : > { %3606 = vmatprep.subr.bf16.mxu0 %v3918_v62  ;;  %3464 = vmatprep.mubr.bf16.mxu1 %v833_v63  ;;  %v2612_v63 = vrot.slane %v2610_v50, 1  ;;  %v2608_v2 = vor.u32 %v2606_v54, %v2604_v53 }
  0x83   : > { %3592 = vmatprep.mubr.bf16.mxu0 %v3920_v1  ;;  %v2605_v1 = vsel %vm773_vm0, %v2600_v52, %v2604_v53 }
  0x84   : > { %3479 = vmatpush3.bf16.msra.mxu1 %v3917_v60  ;;  %v2582_v60 = vshrl.u32 %v3955_v43, 16 }
  0x85   : > { %3607 = vmatpush3.bf16.msra.mxu0 %v3918_v62  ;;  %3480 = vmatprep.subr.bf16.mxu1 %v3922_v4  ;;  %v2573_v62 = vsel %vm773_vm0, %v2568_v48, %v2572_v49 }
  0x86   : > { %3608 = vmatprep.subr.bf16.mxu0 %v3924_v5 }
  0x87   : > { %3465 = vmatmul.mubr.bf16.gmra.mrb[12].mxu1 %v841_v7  ;;  %v2620_v7 = vrot.slane %v2618_v59, 1 }
  0x88   : > { %3593 = vmatmul.mubr.bf16.gmra.mrb[12].mxu0 %v3923_v6  ;;  %3481 = vmatpush3.bf16.msra.mxu1 %v3922_v4  ;;  %v3959_v4 = vld [vmem:[%s4040_s16 + $0x48] ss:$0 sps:$4 sm:$0x11]   ;;  %v2616_v6 = vor.u32 %v2614_v58, %v2612_v63 }
  0x89   : > { %3609 = vmatpush3.bf16.msra.mxu0 %v3924_v5  ;;  %3482 = vmatprep.subr.bf16.mxu1 %v3925_v8  ;;  %v2576_v5 = vor.u32 %v2574_v57, %v2572_v49 }
  0x8a   : > { %3610 = vmatprep.subr.bf16.mxu0 %v3926_v9  ;;  %3484 = vmatprep.mubr.bf16.mxu1 %v3927_v10  ;;  %v2613_v10 = vsel %vm773_vm0, %v2608_v2, %v2612_v63 }
  0x8b   : > { %3612 = vmatprep.mubr.bf16.mxu0 %v3928_v11  ;;  %v2622_v11 = vshrl.u32 %v3958_v45, 16 }
  0x8c   : > { %3483 = vmatpush3.bf16.msra.mxu1 %v3925_v8  ;;  %v2584_v8 = vor.u32 %v2582_v60, %v2580_v3 }
  0x8d   : > { %3611 = vmatpush3.bf16.msra.mxu0 %v3926_v9  ;;  %3660 = vmatprep.subr.bf16.mxu1 %v3931_v12  ;;  %v2588_v9 = vrot.slane %v2586_v61, 1 }
  0x8e   : > { %3628 = vmatprep.subr.bf16.mxu0 %v3931_v12 }
  0x8f   : > { %3485 = vmatmul.mubr.bf16.vlgmr.msra.gmra.mrb[0].mxu1 %v3929_v13  ;;  %v2581_v13 = vsel %vm773_vm0, %v2576_v5, %v2580_v3 }
  0x90   : > { %3613 = vmatmul.mubr.bf16.vlgmr.msra.gmra.mrb[0].mxu0 %v3930_v14  ;;  %3668 = vmatpush3.bf16.msra.mxu1 %v3931_v12  ;;  %v2621_v14 = vsel %vm773_vm0, %v2616_v6, %v2620_v7 }
  0x91   : > { %3629 = vmatpush3.bf16.msra.mxu0 %v3931_v12  ;;  %3661 = vmatprep.subr.bf16.mxu1 %v3932_v15  ;;  %v2626_v12 = vshll.u32 %v3959_v4, 16 }
  0x92   : > { %3630 = vmatprep.subr.bf16.mxu0 %v3932_v15  ;;  %3488 = vmatprep.mubr.bf16.mxu1 %v3933_v16  ;;  %v2589_v16 = vsel %vm773_vm0, %v2584_v8, %v2588_v9 }
  0x93   : > { %3616 = vmatprep.mubr.bf16.mxu0 %v3934_v17  ;;  %v2624_v17 = vor.u32 %v2622_v11, %v2620_v7 }
  0x94   : > { %3669 = vmatpush3.bf16.msra.mxu1 %v3932_v15 }
  0x95   : > { %3631 = vmatpush3.bf16.msra.mxu0 %v3932_v15  ;;  %3662 = vmatprep.subr.bf16.mxu1 %v3937_v18  ;;  %v2590_v15 = vshrl.u32 %v3957_v46, 16 }
  0x96   : > { %3632 = vmatprep.subr.bf16.mxu0 %v3937_v18 }
  0x97   : > { %3489 = vmatmul.mubr.bf16.gmra.mrb[4].mxu1 %v3935_v19  ;;  %v2592_v19 = vor.u32 %v2590_v15, %v2588_v9 }
  0x98   : > { %3617 = vmatmul.mubr.bf16.gmra.mrb[4].mxu0 %v3936_v20  ;;  %3670 = vmatpush3.bf16.msra.mxu1 %v3937_v18 }
  0x99   : > { %3633 = vmatpush3.bf16.msra.mxu0 %v3937_v18  ;;  %3663 = vmatprep.subr.bf16.mxu1 %v3938_v21  ;;  %v2628_v18 = vrot.slane %v2626_v12, 1 }
  0x9a   : > { %3634 = vmatprep.subr.bf16.mxu0 %v3938_v21  ;;  %3492 = vmatprep.mubr.bf16.mxu1 %v3939_v22  ;;  %v174_v22 = vlaneseq }
  0x9b   : > { %3620 = vmatprep.mubr.bf16.mxu0 %v3940_v23  ;;  %v2629_v20 = vsel %vm773_vm0, %v2624_v17, %v2628_v18  ;;  %v173_v23 = vld [vmem:[%s4377_s2] sm:$0x1] }
  0x9c   : > { %3671 = vmatpush3.bf16.msra.mxu1 %v3938_v21  ;;  %vm176_vm1 = vcmp.lt.s32.totalorder %v174_v22, 4 }
  0x9d   : > { %3635 = vmatpush3.bf16.msra.mxu0 %v3938_v21  ;;  %3664 = vmatprep.subr.bf16.mxu1 %v3943_v24  ;;  %v2597_v21 = vsel %vm773_vm0, %v2592_v19, %v4307_v40 }
  0x9e   : > { %3636 = vmatprep.subr.bf16.mxu0 %v3943_v24 }
  0x9f   : > { %3493 = vmatmul.mubr.bf16.gmra.mrb[8].mxu1 %v3941_v25 }
  0xa0   : > { %3621 = vmatmul.mubr.bf16.gmra.mrb[8].mxu0 %v3942_v27  ;;  %3672 = vmatpush3.bf16.msra.mxu1 %v3943_v24 }
  0xa1   : > { %3637 = vmatpush3.bf16.msra.mxu0 %v3943_v24  ;;  %3665 = vmatprep.subr.bf16.mxu1 %v3944_v32  ;;  %v177_v24 = vsel %vm176_vm1, %v173_v23, %v9_v0 }
  0xa2   : > { %3638 = vmatprep.subr.bf16.mxu0 %v3944_v32  ;;  %3496 = vmatprep.mubr.bf16.mxu1 %v3945_v33  ;;  %179 = vst [vmem:[#allocation8] sm:$0x1] %v177_v24 }
  0xa3   : > { %3624 = vmatprep.mubr.bf16.mxu0 %v3946_v34 }
  0xa4   : > { %3673 = vmatpush3.bf16.msra.mxu1 %v3944_v32 }
  0xa5   : > { %3639 = vmatpush3.bf16.msra.mxu0 %v3944_v32  ;;  %3666 = vmatprep.subr.bf16.mxu1 %v3949_v44 }
  0xa6   : > { %3640 = vmatprep.subr.bf16.mxu0 %v3949_v44 }
  0xa7   : > { %3497 = vmatmul.mubr.bf16.gmra.mrb[12].mxu1 %v3947_v47 }
  0xa8   : > { %3625 = vmatmul.mubr.bf16.gmra.mrb[12].mxu0 %v3948_v51  ;;  %3674 = vmatpush3.bf16.msra.mxu1 %v3949_v44 }
  0xa9   : > { %3641 = vmatpush3.bf16.msra.mxu0 %v3949_v44  ;;  %3667 = vmatprep.subr.bf16.mxu1 %v3950_v56  ;;  %v3224_v57 = vld [vmem:[#allocation8] ss:$0 sm:$0xff] }
  0xaa   : > { %3642 = vmatprep.subr.bf16.mxu0 %v3950_v56  ;;  %3644 = vmatprep.mubr.bf16.mxu0 %v2573_v62 }
  0xab   : > { %3652 = vmatprep.mubr.bf16.mxu1 %v2605_v1 }
  0xac   : > { %3675 = vmatpush3.bf16.msra.mxu1 %v3950_v56 }
  0xad   : > { %3643 = vmatpush3.bf16.msra.mxu0 %v3950_v56 }
  0xaf   : > { %3653 = vmatmul.mubr.bf16.vlgmr.msra.gmra.mrb[16].mxu1 %v2613_v10 }
  0xb0   : > { %3645 = vmatmul.mubr.bf16.vlgmr.msra.gmra.mrb[0].mxu0 %v2581_v13  ;;  %3656 = vmatprep.mubr.bf16.mxu1 %v2621_v14 }
  0xb1   : > { %3648 = vmatprep.mubr.bf16.mxu0 %v2589_v16 }
  0xb7   : > { %3657 = vmatmul.mubr.bf16.gmra.mrb[20].mxu1 %v2629_v20 }
  0xb8   : > { %3649 = vmatmul.mubr.bf16.gmra.mrb[4].mxu0 %v2597_v21 }
 0x162   : > { %v3486_v25 = vpop.f32.mrb[0].mxu1 }
 0x163   : > { %v1206_v26 = vpop.f32.mrb[1].mxu1 }
 0x164   : > { %v3487_v27 = vpop.f32.mrb[2].mxu1 }
 0x165   : > { %v1209_v28 = vpop.f32.mrb[3].mxu1 }
 0x16a   : > { %v4338_v29 = vpop.f32.mrb[4].mxu1 }
 0x16b   : > { %v4340_v30 = vpop.f32.mrb[5].mxu1 }
 0x16c   : > { %v4342_v31 = vpop.f32.mrb[6].mxu1 }
 0x16d   : > { %v4344_v32 = vpop.f32.mrb[7].mxu1 }
 0x172   : > { %v3494_v33 = vpop.f32.mrb[8].mxu1 }
 0x173   : > { %v3622_v34 = vpop.f32.mrb[8].mxu0  ;;  %v1238_v35 = vpop.f32.mrb[9].mxu1 }
 0x174   : > { %v3684_v36 = vadd.f32 %v3622_v34, %v3494_v33  ;;  %v2406_v37 = vpop.f32.mrb[9].mxu0  ;;  %v3495_v38 = vpop.f32.mrb[10].mxu1 }
 0x175   : > { %v3686_v39 = vadd.f32 %v2406_v37, %v1238_v35  ;;  %v3623_v40 = vpop.f32.mrb[10].mxu0  ;;  %v1241_v41 = vpop.f32.mrb[11].mxu1 }
 0x176   : > { %v3688_v42 = vadd.f32 %v3623_v40, %v3495_v38  ;;  %v2409_v43 = vpop.f32.mrb[11].mxu0 }
 0x177   : > { %v3690_v44 = vadd.f32 %v2409_v43, %v1241_v41 }
 0x17a   : > { %v3498_v45 = vpop.f32.mrb[12].mxu1 }
 0x17b   : > { %v3626_v46 = vpop.f32.mrb[12].mxu0  ;;  %v1254_v47 = vpop.f32.mrb[13].mxu1 }
 0x17c   : > { %v3692_v48 = vadd.f32 %v3626_v46, %v3498_v45  ;;  %v2422_v49 = vpop.f32.mrb[13].mxu0  ;;  %v3499_v50 = vpop.f32.mrb[14].mxu1 }
 0x17d   : > { %v3694_v51 = vadd.f32 %v2422_v49, %v1254_v47  ;;  %v3627_v52 = vpop.f32.mrb[14].mxu0  ;;  %v1257_v53 = vpop.f32.mrb[15].mxu1 }
 0x17e   : > { %v3696_v54 = vadd.f32 %v3627_v52, %v3499_v50  ;;  %v2425_v55 = vpop.f32.mrb[15].mxu0 }
 0x17f   : > { %v3698_v56 = vadd.f32 %v2425_v55, %v1257_v53 }
 0x182   : > { %v3654_v58 = vpop.f32.mrb[16].mxu1 }
 0x183   : > { %v3646_v59 = vpop.f32.mrb[0].mxu0  ;;  %v3685_v60 = vadd.f32 %v3684_v36, %v3654_v58  ;;  %v2752_v61 = vpop.f32.mrb[17].mxu1 }
 0x184   : > { %v3676_v62 = vadd.f32 %v3646_v59, %v3486_v25  ;;  %v2720_v63 = vpop.f32.mrb[1].mxu0  ;;  %v3687_v1 = vadd.f32 %v3686_v39, %v2752_v61  ;;  %v3655_v2 = vpop.f32.mrb[18].mxu1 }
 0x185   : > { %v2864_v3 = vadd.f32 %v3685_v60, %v3224_v57  ;;  %v3677_v4 = vadd.f32 %v2720_v63, %v1206_v26  ;;  %v3647_v5 = vpop.f32.mrb[2].mxu0  ;;  %v3689_v6 = vadd.f32 %v3688_v42, %v3655_v2  ;;  %v2755_v7 = vpop.f32.mrb[19].mxu1 }
 0x186   : > { %v2856_v8 = vadd.f32 %v3676_v62, %v3224_v57  ;;  %v2862_v9 = vadd.f32 %v3687_v1, %v3224_v57  ;;  %v3678_v10 = vadd.f32 %v3647_v5, %v3487_v27  ;;  %v2723_v11 = vpop.f32.mrb[3].mxu0  ;;  %v3691_v12 = vadd.f32 %v3690_v44, %v2755_v7 }
 0x187   : > { %2880 = vst [vmem:[%s4350_s8 + $0x50] sm:$0xff] %v2864_v3  ;;  %v2854_v13 = vadd.f32 %v3677_v4, %v3224_v57  ;;  %v2865_v14 = vadd.f32 %v3689_v6, %v3224_v57  ;;  %v3679_v15 = vadd.f32 %v2723_v11, %v1209_v28 }
 0x188   : > { %2872 = vst [vmem:[%s4350_s8 + $0x10] sm:$0xff] %v2856_v8  ;;  %2878 = vst [vmem:[%s4350_s8 + $0x40] sm:$0xff] %v2862_v9  ;;  %v2857_v16 = vadd.f32 %v3678_v10, %v3224_v57  ;;  %v2863_v17 = vadd.f32 %v3691_v12, %v3224_v57 }
 0x189   : > { %2870 = vst [vmem:[%s4350_s8] sm:$0xff] %v2854_v13  ;;  %2881 = vst [vmem:[%s4350_s8 + $0x58] sm:$0xff] %v2865_v14  ;;  %v2855_v18 = vadd.f32 %v3679_v15, %v3224_v57 }
 0x18a   : > { %2873 = vst [vmem:[%s4350_s8 + $0x18] sm:$0xff] %v2857_v16  ;;  %2879 = vst [vmem:[%s4350_s8 + $0x48] sm:$0xff] %v2863_v17  ;;  %v3658_v19 = vpop.f32.mrb[20].mxu1 }
 0x18b   : > { %2871 = vst [vmem:[%s4350_s8 + $0x8] sm:$0xff] %v2855_v18  ;;  %v3650_v20 = vpop.f32.mrb[4].mxu0  ;;  %v3693_v21 = vadd.f32 %v3692_v48, %v3658_v19  ;;  %v2768_v22 = vpop.f32.mrb[21].mxu1 }
 0x18c   : > { %v3680_v23 = vadd.f32 %v3650_v20, %v4338_v29  ;;  %v2736_v24 = vpop.f32.mrb[5].mxu0  ;;  %v3695_v25 = vadd.f32 %v3694_v51, %v2768_v22  ;;  %v3659_v26 = vpop.f32.mrb[22].mxu1 }
 0x18d   : > { %v2868_v27 = vadd.f32 %v3693_v21, %v3224_v57  ;;  %v3681_v28 = vadd.f32 %v2736_v24, %v4340_v30  ;;  %v3651_v33 = vpop.f32.mrb[6].mxu0  ;;  %v3697_v34 = vadd.f32 %v3696_v54, %v3659_v26  ;;  %v2771_v35 = vpop.f32.mrb[23].mxu1 }
 0x18e   : > { %v2860_v36 = vadd.f32 %v3680_v23, %v3224_v57  ;;  %v2866_v37 = vadd.f32 %v3695_v25, %v3224_v57  ;;  %v3682_v38 = vadd.f32 %v3651_v33, %v4342_v31  ;;  %v2739_v29 = vpop.f32.mrb[7].mxu0  ;;  %v3699_v39 = vadd.f32 %v3698_v56, %v2771_v35 }
 0x18f   : > { %2884 = vst [vmem:[%s4350_s8 + $0x70] sm:$0xff] %v2868_v27  ;;  %v2858_v40 = vadd.f32 %v3681_v28, %v3224_v57  ;;  %v2869_v41 = vadd.f32 %v3697_v34, %v3224_v57  ;;  %v3683_v42 = vadd.f32 %v2739_v29, %v4344_v32 }
 0x190   : > { %2876 = vst [vmem:[%s4350_s8 + $0x30] sm:$0xff] %v2860_v36  ;;  %2882 = vst [vmem:[%s4350_s8 + $0x60] sm:$0xff] %v2866_v37  ;;  %v2861_v30 = vadd.f32 %v3682_v38, %v3224_v57  ;;  %v2867_v43 = vadd.f32 %v3699_v39, %v3224_v57 }
 0x191   : > { %2874 = vst [vmem:[%s4350_s8 + $0x20] sm:$0xff] %v2858_v40  ;;  %2885 = vst [vmem:[%s4350_s8 + $0x78] sm:$0xff] %v2869_v41  ;;  %v2859_v44 = vadd.f32 %v3683_v42, %v3224_v57 }
 0x192   : > { %2877 = vst [vmem:[%s4350_s8 + $0x38] sm:$0xff] %v2861_v30  ;;  %2883 = vst [vmem:[%s4350_s8 + $0x68] sm:$0xff] %v2867_v43 }
 0x193   : > { %2875 = vst [vmem:[%s4350_s8 + $0x28] sm:$0xff] %v2859_v44 }
 0x194 PF: > { %s15_s17 = sadd.s32 1, %s3966_s17  }
 0x195   : > { %p12_p4 = scmp.ge.s32.totalorder %s15_s17, 4  }
 0x197   :  { %14 = sbr.rel (!%p12_p4) target bundleno = 2 (0x2), region = 70 }

// kernel: last_level_maxpool_v2.4
= control target key start
LH: loop header
LB: loop body
LE: loop exit
PB: predicated region body
PF: predicated region fallthrough
CT: control target
= control target key end

     0   :  { %s2856_s17 = smov 0   ;;  %s3165_s0 = inlined_call_operand.vmem [shape: bf16[2,320,128], index: 0, kind: input, shape index: {}]   ;;  %s3166_s1 = inlined_call_operand.vmem [shape: bf16[9,128,128], index: 1, kind: input, shape index: {}]   ;;  %s3167_s2 = inlined_call_operand.vmem [shape: f32[4], index: 2, kind: input, shape index: {}]   ;;  %s3168_s3 = inlined_call_operand.<no memory space> [shape: f32[], index: 3, kind: input, shape index: {}]   ;;  %s3169_s4 = inlined_call_operand.vmem [shape: f32[2,4,16,128], index: 4, kind: output, shape index: {}]  }
   0x1   :  { %v9_v0 = vstv %s3168_s3 }
   0x2 LB: > { %s2045_s18 = sadd.s32 4294967295, %s2826_s17   ;;  %p2049_p0 = scmp.ge.s32.totalorder %s2826_s17, 1  ;;  %s2826_s17 = sphi %s2856_s17, %s15_s17  }
   0x3   : > { %p139_p1 = scmp.lt.s32.totalorder %s2826_s17, 3 }
   0x5   : > { %p140_p2 = pnand %p2049_p0, %p139_p1 }
   0x7   : > { %143 = sbr.rel (%p140_p2) target bundleno = 396 (0x18c), region = 32 }
   0xe   : > { %v2709_v1 = vld [vmem:[%s3166_s1] sm:$0xff]   ;;  %p163_p3 = scmp.lt.s32.totalorder %s2045_s18, 1  ;;  %v2711_v3 = vld [vmem:[%s3166_s1 + $0x8] sm:$0xff]   ;;  %v2713_v5 = vld [vmem:[%s3166_s1 + $0x10] sm:$0xff]   ;;  %vm585_vm0 = vsmask.f32 7424 }
   0xf   : > { %v2710_v2 = vld [vmem:[%s3166_s1 + $0x100] sm:$0xff]   ;;  %2404 = vmatprep.subr.bf16.mxu1 %v2709_v1  ;;  %v2712_v4 = vld [vmem:[%s3166_s1 + $0x108] sm:$0xff]   ;;  %v2714_v6 = vld [vmem:[%s3166_s1 + $0x110] sm:$0xff]  }
  0x10   : > { %2500 = vmatprep.subr.bf16.mxu0 %v2710_v2  ;;  %2405 = vmatpush3.bf16.msra.mxu1 %v2709_v1  ;;  %s3171_s18 = smov (!%p163_p3, %s2045_s18), 1  ;;  %v2715_v7 = vld [vmem:[%s3166_s1 + $0x18] sm:$0xff]   ;;  %v2717_v9 = vld [vmem:[%s3166_s1 + $0x20] sm:$0xff]   ;;  %v2719_v11 = vld [vmem:[%s3166_s1 + $0x28] sm:$0xff]  }
  0x11   : > { %2501 = vmatpush3.bf16.msra.mxu0 %v2710_v2  ;;  %2406 = vmatprep.subr.bf16.mxu1 %v2711_v3  ;;  %v2716_v8 = vld [vmem:[%s3166_s1 + $0x118] sm:$0xff]   ;;  %s2700_s9 = smul.u32 160, %s3171_s18  ;;  %v2718_v10 = vld [vmem:[%s3166_s1 + $0x120] sm:$0xff]   ;;  %v2720_v13 = vld [vmem:[%s3166_s1 + $0x128] sm:$0xff]   ;;  %s2295_s5 = sshll.u32 %s3171_s18, 6 }
  0x12   : > { %2502 = vmatprep.subr.bf16.mxu0 %v2712_v4  ;;  %v2721_v15 = vld [vmem:[%s3166_s1 + $0x30] sm:$0xff]   ;;  %v2723_v17 = vld [vmem:[%s3166_s1 + $0x38] sm:$0xff]   ;;  %v2726_v19 = vld [vmem:[%s3166_s1 + $0x40] sm:$0xff]   ;;  %s172_s8 = scalar_lea.vmem %s3169_s4, %s2295_s5 }
  0x13   : > { %s2900_s16 = scalar_lea.vmem %s3165_s0, %s2700_s9  ;;  %v2722_v16 = vld [vmem:[%s3166_s1 + $0x130] sm:$0xff]   ;;  %v2724_v18 = vld [vmem:[%s3166_s1 + $0x138] sm:$0xff]   ;;  %v2728_v20 = vld [vmem:[%s3166_s1 + $0x140] sm:$0xff]  }
  0x14   : > { %2407 = vmatpush3.bf16.msra.mxu1 %v2711_v3  ;;  %v2725_v12 = vld [vmem:[%s2900_s16] sm:$0xff]   ;;  %v2727_v14 = vld [vmem:[%s2900_s16 + $0x78] sm:$0xff]   ;;  %v2729_v21 = vld [vmem:[%s2900_s16 + $0x8] sm:$0xff]  }
  0x15   : > { %2503 = vmatpush3.bf16.msra.mxu0 %v2712_v4  ;;  %2408 = vmatprep.subr.bf16.mxu1 %v2713_v5  ;;  %v2730_v22 = vld [vmem:[%s2900_s16 + $0x80] sm:$0xff]   ;;  %v2731_v23 = vld [vmem:[%s3166_s1 + $0x48] sm:$0xff]   ;;  %v2741_v25 = vld [vmem:[%s2900_s16 + $0x10] sm:$0xff]  }
  0x16   : > { %2504 = vmatprep.subr.bf16.mxu0 %v2714_v6  ;;  %2420 = vmatprep.mubr.bf16.mxu1 %v2725_v12  ;;  %v2732_v24 = vld [vmem:[%s3166_s1 + $0x148] sm:$0xff]   ;;  %v2733_v27 = vld [vmem:[%s3166_s1 + $0x50] sm:$0xff]   ;;  %v2735_v29 = vld [vmem:[%s3166_s1 + $0x58] sm:$0xff]  }
  0x17   : > { %2516 = vmatprep.mubr.bf16.mxu0 %v2727_v14  ;;  %v2743_v26 = vld [vmem:[%s2900_s16 + $0x88] sm:$0xff]   ;;  %v2734_v28 = vld [vmem:[%s3166_s1 + $0x150] sm:$0xff]   ;;  %v2745_v30 = vld [vmem:[%s2900_s16 + $0x18] sm:$0xff]  }
  0x18   : > { %2409 = vmatpush3.bf16.msra.mxu1 %v2713_v5  ;;  %v2746_v31 = vld [vmem:[%s2900_s16 + $0x90] sm:$0xff]   ;;  %v2736_v32 = vld [vmem:[%s3166_s1 + $0x158] sm:$0xff]   ;;  %v2749_v33 = vld [vmem:[%s2900_s16 + $0x28] sm:$0xff]  }
  0x19   : > { %2505 = vmatpush3.bf16.msra.mxu0 %v2714_v6  ;;  %2410 = vmatprep.subr.bf16.mxu1 %v2715_v7  ;;  %v2737_v34 = vld [vmem:[%s3166_s1 + $0x60] sm:$0xff]   ;;  %v2751_v36 = vld [vmem:[%s2900_s16 + $0x50] sm:$0xff]   ;;  %v2752_v37 = vld [vmem:[%s2900_s16 + $0x58] sm:$0xff]  }
  0x1a   : > { %2506 = vmatprep.subr.bf16.mxu0 %v2716_v8  ;;  %v2738_v35 = vld [vmem:[%s3166_s1 + $0x160] sm:$0xff]   ;;  %v1185_v38 = vshrl.u32 %v2751_v36, 16  ;;  %v1187_v39 = vshll.u32 %v2751_v36, 16  ;;  %v1192_v40 = vshll.u32 %v2752_v37, 16  ;;  %v2739_v42 = vld [vmem:[%s3166_s1 + $0x68] sm:$0xff]   ;;  %v2742_v46 = vld [vmem:[%s3166_s1 + $0x70] sm:$0xff]  }
  0x1b   : > { %v2740_v44 = vld [vmem:[%s3166_s1 + $0x168] sm:$0xff]   ;;  %v2755_v48 = vld [vmem:[%s2900_s16 + $0x60] sm:$0xff]   ;;  %v2744_v49 = vld [vmem:[%s3166_s1 + $0x170] sm:$0xff]   ;;  %v1196_v51 = vshrl.u32 %v2752_v37, 16 }
  0x1c   : > { %2411 = vmatpush3.bf16.msra.mxu1 %v2715_v7  ;;  %v1189_v41 = vrot.slane %v1187_v39, 1  ;;  %v1194_v43 = vrot.slane %v1192_v40, 1  ;;  %v2747_v50 = vld [vmem:[%s3166_s1 + $0x78] sm:$0xff]   ;;  %v1200_v52 = vshll.u32 %v2755_v48, 16  ;;  %v2750_v54 = vld [vmem:[%s3166_s1 + $0x80] sm:$0xff]   ;;  %v1204_v56 = vshrl.u32 %v2755_v48, 16 }
  0x1d   : > { %2507 = vmatpush3.bf16.msra.mxu0 %v2716_v8  ;;  %2412 = vmatprep.subr.bf16.mxu1 %v2717_v9  ;;  %v2748_v53 = vld [vmem:[%s3166_s1 + $0x178] sm:$0xff]   ;;  %v2753_v55 = vld [vmem:[%s3166_s1 + $0x180] sm:$0xff]   ;;  %v2768_v59 = vld [vmem:[%s2900_s16 + $0x68] sm:$0xff]  }
  0x1e   : > { %2508 = vmatprep.subr.bf16.mxu0 %v2718_v10  ;;  %v1190_v45 = vor.u32 %v1189_v41, %v1185_v38  ;;  %v1198_v57 = vor.u32 %v1196_v51, %v1194_v43  ;;  %v1202_v58 = vrot.slane %v1200_v52, 1  ;;  %v2754_v60 = vld [vmem:[%s2900_s16 + $0x30] sm:$0xff]   ;;  %v2756_v61 = vld [vmem:[%s3166_s1 + $0x88] sm:$0xff]   ;;  %v1208_v62 = vshll.u32 %v2768_v59, 16  ;;  %v2766_v6 = vld [vmem:[%s2900_s16 + $0x38] sm:$0xff]  }
  0x1f   : > { %v2757_v63 = vld [vmem:[%s3166_s1 + $0x188] sm:$0xff]   ;;  %v2771_v2 = vld [vmem:[%s2900_s16 + $0x70] ss:$0 sps:$4 sm:$0x11]   ;;  %v1212_v5 = vshrl.u32 %v2768_v59, 16  ;;  %v2772_v37 = vld [vmem:[%s3166_s1 + $0xb8] sm:$0xff]  }
  0x20   : > { %2413 = vmatpush3.bf16.msra.mxu1 %v2717_v9  ;;  %v1195_v47 = vsel %vm585_vm0, %v1190_v45, %v1194_v43  ;;  %v1206_v1 = vor.u32 %v1204_v56, %v1202_v58  ;;  %v1203_v3 = vsel %vm585_vm0, %v1198_v57, %v1202_v58  ;;  %v1210_v4 = vrot.slane %v1208_v62, 1  ;;  %v2774_v9 = vld [vmem:[%s2900_s16] sm:$0xff]   ;;  %v2759_v14 = vld [vmem:[%s3166_s1 + $0x190] sm:$0xff]   ;;  %v2773_v38 = vld [vmem:[%s3166_s1 + $0x1b8] sm:$0xff]  }
  0x21   : > { %2509 = vmatpush3.bf16.msra.mxu0 %v2718_v10  ;;  %2414 = vmatprep.subr.bf16.mxu1 %v2719_v11  ;;  %v1216_v7 = vshll.u32 %v2771_v2, 16  ;;  %v3001_v10 = vld [vmem:[%s2900_s16 + $0x8] sm:$0xff]   ;;  %v2793_v39 = vld [vmem:[%s2900_s16 + $0x20] ss:$0 sps:$4 sm:$0x11]   ;;  %v2783_v58 = vld [vmem:[%s3166_s1 + $0xd0] sm:$0xff]  }
  0x22   : > { %2510 = vmatprep.subr.bf16.mxu0 %v2720_v13  ;;  %v1211_v8 = vsel %vm585_vm0, %v1206_v1, %v1210_v4  ;;  %v1214_v12 = vor.u32 %v1212_v5, %v1210_v4  ;;  %v2778_v45 = vld [vmem:[%s3166_s1 + $0x1c0] sm:$0xff]   ;;  %v618_v51 = vshll.u32 %v2793_v39, 16  ;;  %v2781_v52 = vld [vmem:[%s3166_s1 + $0xc8] sm:$0xff]   ;;  %v2784_v59 = vld [vmem:[%s3166_s1 + $0x1d0] sm:$0xff]  }
  0x23   : > { %v2795_v62 = vld [vmem:[%s2900_s16 + $0x20] sm:$0xff]   ;;  %v2799_v1 = vld [vmem:[%s2900_s16 + $0x50] sm:$0xff]   ;;  %v2789_v5 = vld [vmem:[%s3166_s1 + $0xe8] sm:$0xff]  }
  0x24   : > { %2415 = vmatpush3.bf16.msra.mxu1 %v2719_v11  ;;  %v2758_v11 = vld [vmem:[%s3166_s1 + $0x90] sm:$0xff]   ;;  %v620_v57 = vrot.slane %v618_v51, 1  ;;  %v2788_v4 = vld [vmem:[%s3166_s1 + $0x1e0] sm:$0xff]  }
  0x25   : > { %2511 = vmatpush3.bf16.msra.mxu0 %v2720_v13  ;;  %2416 = vmatprep.subr.bf16.mxu1 %v2721_v15  ;;  %v1218_v13 = vrot.slane %v1216_v7, 1  ;;  %v2800_v2 = vld [vmem:[%s2900_s16 + $0x30] sm:$0xff]   ;;  %v2811_v39 = vld [vmem:[%s3166_s1 + $0x220] sm:$0xff]  }
  0x26   : > { %2512 = vmatprep.subr.bf16.mxu0 %v2722_v16  ;;  %v2794_v7 = vld [vmem:[%s3166_s1 + $0xf0] sm:$0xff]  }
  0x28   : > { %2417 = vmatpush3.bf16.msra.mxu1 %v2721_v15  ;;  %v587_v15 = vshrl.u32 %v2774_v9, 16 }
  0x29   : > { %2513 = vmatpush3.bf16.msra.mxu0 %v2722_v16  ;;  %2418 = vmatprep.subr.bf16.mxu1 %v2723_v17  ;;  %v589_v16 = vshll.u32 %v2774_v9, 16  ;;  %v2797_v9 = vld [vmem:[%s3166_s1 + $0xf8] sm:$0xff]  }
  0x2a   : > { %2514 = vmatprep.subr.bf16.mxu0 %v2724_v18 }
  0x2c   : > { %2419 = vmatpush3.bf16.msra.mxu1 %v2723_v17  ;;  %v594_v17 = vshll.u32 %v3001_v10, 16 }
  0x2d   : > { %2515 = vmatpush3.bf16.msra.mxu0 %v2724_v18  ;;  %2428 = vmatprep.subr.bf16.mxu1 %v2726_v19  ;;  %v2770_v18 = vld [vmem:[%s2900_s16 + $0x40] sm:$0xff]  }
  0x2e   : > { %2524 = vmatprep.subr.bf16.mxu0 %v2728_v20 }
  0x2f   : > { %2421 = vmatmul.mubr.bf16.vlgmr.msra.gmra.mrb[0].mxu1 %v2729_v21  ;;  %v2760_v21 = vld [vmem:[%s3166_s1 + $0x98] sm:$0xff]  }
  0x30   : > { %2429 = vmatpush3.bf16.msra.mxu1 %v2726_v19  ;;  %2517 = vmatmul.mubr.bf16.vlgmr.msra.gmra.mrb[0].mxu0 %v2730_v22  ;;  %v591_v19 = vrot.slane %v589_v16, 1  ;;  %v1219_v22 = vsel %vm585_vm0, %v1214_v12, %v1218_v13  ;;  %v2817_v12 = vld [vmem:[%s2900_s16 + $0x18] sm:$0xff]   ;;  %v2803_v13 = vld [vmem:[%s3166_s1 + $0x200] sm:$0xff]  }
  0x31   : > { %2525 = vmatpush3.bf16.msra.mxu0 %v2728_v20  ;;  %2430 = vmatprep.subr.bf16.mxu1 %v2731_v23  ;;  %v596_v20 = vrot.slane %v594_v17, 1  ;;  %v2802_v17 = vld [vmem:[%s2900_s16 + $0x38] sm:$0xff]  }
  0x32   : > { %2526 = vmatprep.subr.bf16.mxu0 %v2732_v24  ;;  %2424 = vmatprep.mubr.bf16.mxu1 %v2741_v25  ;;  %v2777_v25 = vld [vmem:[%s2900_s16 + $0x8] sm:$0xff]  }
  0x33   : > { %2520 = vmatprep.mubr.bf16.mxu0 %v2743_v26 }
  0x34   : > { %2431 = vmatpush3.bf16.msra.mxu1 %v2731_v23  ;;  %v2761_v23 = vld [vmem:[%s3166_s1 + $0x198] sm:$0xff]  }
  0x35   : > { %2527 = vmatpush3.bf16.msra.mxu0 %v2732_v24  ;;  %2432 = vmatprep.subr.bf16.mxu1 %v2733_v27  ;;  %v592_v24 = vor.u32 %v591_v19, %v587_v15  ;;  %v3111_v15 = vld [vmem:[%s2900_s16 + $0x10] sm:$0xff]   ;;  %v1798_v19 = vshll.u32 %v2817_v12, 16 }
  0x36   : > { %2528 = vmatprep.subr.bf16.mxu0 %v2734_v28 }
  0x37   : > { %2425 = vmatmul.mubr.bf16.gmra.mrb[4].mxu1 %v2745_v30  ;;  %v597_v26 = vsel %vm585_vm0, %v592_v24, %v596_v20  ;;  %v2765_v30 = vld [vmem:[%s3166_s1 + $0x1a8] sm:$0xff]  }
  0x38   : > { %2433 = vmatpush3.bf16.msra.mxu1 %v2733_v27  ;;  %2521 = vmatmul.mubr.bf16.gmra.mrb[4].mxu0 %v2746_v31  ;;  %v2762_v27 = vld [vmem:[%s3166_s1 + $0xa0] sm:$0xff]   ;;  %v2779_v31 = vld [vmem:[%s2900_s16 + $0x10] sm:$0xff]  }
  0x39   : > { %2529 = vmatpush3.bf16.msra.mxu0 %v2734_v28  ;;  %2434 = vmatprep.subr.bf16.mxu1 %v2735_v29  ;;  %v2763_v28 = vld [vmem:[%s3166_s1 + $0x1a0] sm:$0xff]   ;;  %v602_v36 = vshll.u32 %v2779_v31, 16  ;;  %v606_v40 = vshrl.u32 %v2779_v31, 16 }
  0x3a   : > { %2530 = vmatprep.subr.bf16.mxu0 %v2736_v32  ;;  %2444 = vmatprep.mubr.bf16.mxu1 %v2749_v33  ;;  %v2769_v33 = vld [vmem:[%s3166_s1 + $0x1b0] sm:$0xff]  }
  0x3b   : > { %2540 = vmatprep.mubr.bf16.mxu0 %v1195_v47  ;;  %v604_v43 = vrot.slane %v602_v36, 1  ;;  %v2810_v36 = vld [vmem:[%s3166_s1 + $0x218] sm:$0xff]  }
  0x3c   : > { %2435 = vmatpush3.bf16.msra.mxu1 %v2735_v29  ;;  %v2764_v29 = vld [vmem:[%s3166_s1 + $0xa8] sm:$0xff]  }
  0x3d   : > { %2531 = vmatpush3.bf16.msra.mxu0 %v2736_v32  ;;  %2436 = vmatprep.subr.bf16.mxu1 %v2737_v34  ;;  %v2767_v32 = vld [vmem:[%s3166_s1 + $0xb0] sm:$0xff]   ;;  %v608_v47 = vor.u32 %v606_v40, %v604_v43  ;;  %v2812_v40 = vld [vmem:[%s3166_s1 + $0x228] sm:$0xff]  }
  0x3e   : > { %2532 = vmatprep.subr.bf16.mxu0 %v2738_v35 }
  0x40   : > { %2437 = vmatpush3.bf16.msra.mxu1 %v2737_v34  ;;  %v2791_v34 = vld [vmem:[%s2900_s16 + $0x18] sm:$0xff]  }
  0x41   : > { %2533 = vmatpush3.bf16.msra.mxu0 %v2738_v35  ;;  %2438 = vmatprep.subr.bf16.mxu1 %v2739_v42  ;;  %v598_v35 = vshrl.u32 %v3001_v10, 16  ;;  %v610_v41 = vshll.u32 %v2791_v34, 16  ;;  %v2798_v10 = vld [vmem:[%s3166_s1 + $0x1f8] sm:$0xff]  }
  0x42   : > { %2534 = vmatprep.subr.bf16.mxu0 %v2740_v44 }
  0x43   : > { %v612_v48 = vrot.slane %v610_v41, 1  ;;  %v2819_v41 = vld [vmem:[%s2900_s16 + $0x28] ss:$0 sps:$4 sm:$0x11]  }
  0x44   : > { %2439 = vmatpush3.bf16.msra.mxu1 %v2739_v42  ;;  %v600_v42 = vor.u32 %v598_v35, %v596_v20  ;;  %v2804_v20 = vld [vmem:[%s3166_s1 + $0x208] sm:$0xff]  }
  0x45   : > { %2535 = vmatpush3.bf16.msra.mxu0 %v2740_v44  ;;  %2440 = vmatprep.subr.bf16.mxu1 %v2742_v46  ;;  %v2776_v44 = vld [vmem:[%s3166_s1 + $0xc0] sm:$0xff]  }
  0x46   : > { %2536 = vmatprep.subr.bf16.mxu0 %v2744_v49 }
  0x48   : > { %2441 = vmatpush3.bf16.msra.mxu1 %v2742_v46  ;;  %v2780_v46 = vld [vmem:[%s2900_s16 + $0x10] sm:$0xff]  }
  0x49   : > { %2537 = vmatpush3.bf16.msra.mxu0 %v2744_v49  ;;  %2442 = vmatprep.subr.bf16.mxu1 %v2747_v50  ;;  %v605_v49 = vsel %vm585_vm0, %v600_v42, %v604_v43  ;;  %v2813_v42 = vld [vmem:[%s3166_s1 + $0x230] sm:$0xff]  }
  0x4a   : > { %2538 = vmatprep.subr.bf16.mxu0 %v2748_v53 }
  0x4c   : > { %2443 = vmatpush3.bf16.msra.mxu1 %v2747_v50  ;;  %v614_v50 = vshrl.u32 %v2791_v34, 16 }
  0x4d   : > { %2539 = vmatpush3.bf16.msra.mxu0 %v2748_v53  ;;  %2452 = vmatprep.subr.bf16.mxu1 %v2750_v54  ;;  %v2782_v53 = vld [vmem:[%s3166_s1 + $0x1c8] sm:$0xff]  }
  0x4e   : > { %2548 = vmatprep.subr.bf16.mxu0 %v2753_v55  ;;  %v616_v56 = vor.u32 %v614_v50, %v612_v48 }
  0x4f   : > { %2445 = vmatmul.mubr.bf16.vlgmr.msra.gmra.mrb[0].mxu1 %v2754_v60  ;;  %v2785_v60 = vld [vmem:[%s3166_s1 + $0xd8] sm:$0xff]  }
  0x50   : > { %2453 = vmatpush3.bf16.msra.mxu1 %v2750_v54  ;;  %2541 = vmatmul.mubr.bf16.vlgmr.msra.gmra.mrb[0].mxu0 %v1203_v3  ;;  %v613_v54 = vsel %vm585_vm0, %v608_v47, %v612_v48  ;;  %v2787_v3 = vld [vmem:[%s3166_s1 + $0xe0] sm:$0xff]  }
  0x51   : > { %2549 = vmatpush3.bf16.msra.mxu0 %v2753_v55  ;;  %2454 = vmatprep.subr.bf16.mxu1 %v2756_v61  ;;  %v2792_v55 = vld [vmem:[%s2900_s16 + $0x18] sm:$0xff]  }
  0x52   : > { %2550 = vmatprep.subr.bf16.mxu0 %v2757_v63  ;;  %2448 = vmatprep.mubr.bf16.mxu1 %v2766_v6  ;;  %v2790_v6 = vld [vmem:[%s3166_s1 + $0x1e8] sm:$0xff]  }
  0x53   : > { %2544 = vmatprep.mubr.bf16.mxu0 %v1211_v8  ;;  %v2796_v8 = vld [vmem:[%s3166_s1 + $0x1f0] sm:$0xff]  }
  0x54   : > { %2455 = vmatpush3.bf16.msra.mxu1 %v2756_v61  ;;  %v621_v61 = vsel %vm585_vm0, %v616_v56, %v620_v57 }
  0x55   : > { %2551 = vmatpush3.bf16.msra.mxu0 %v2757_v63  ;;  %2456 = vmatprep.subr.bf16.mxu1 %v2758_v11  ;;  %v2786_v63 = vld [vmem:[%s3166_s1 + $0x1d8] sm:$0xff]  }
  0x56   : > { %2552 = vmatprep.subr.bf16.mxu0 %v2759_v14 }
  0x57   : > { %2449 = vmatmul.mubr.bf16.gmra.mrb[4].mxu1 %v2770_v18  ;;  %v3115_v18 = vld [vmem:[%s2900_s16 + $0x20] sm:$0xff]  }
  0x58   : > { %2457 = vmatpush3.bf16.msra.mxu1 %v2758_v11  ;;  %2545 = vmatmul.mubr.bf16.gmra.mrb[4].mxu0 %v1219_v22  ;;  %v2815_v11 = vld [vmem:[%s2900_s16 + $0x8] sm:$0xff]   ;;  %v2806_v22 = vld [vmem:[%s2900_s16 + $0x40] sm:$0xff]   ;;  %v1810_v43 = vshrl.u32 %v3115_v18, 16 }
  0x59   : > { %2553 = vmatpush3.bf16.msra.mxu0 %v2759_v14  ;;  %2458 = vmatprep.subr.bf16.mxu1 %v2760_v21  ;;  %v2801_v14 = vld [vmem:[%s2900_s16 + $0x58] sm:$0xff]   ;;  %v1785_v16 = vshll.u32 %v2815_v11, 16 }
  0x5a   : > { %2554 = vmatprep.subr.bf16.mxu0 %v2761_v23  ;;  %2468 = vmatprep.mubr.bf16.mxu1 %v597_v26  ;;  %v1800_v26 = vrot.slane %v1798_v19, 1 }
  0x5b   : > { %2564 = vmatprep.mubr.bf16.mxu0 %v2777_v25  ;;  %v1787_v24 = vrot.slane %v1785_v16, 1  ;;  %v1790_v25 = vshll.u32 %v3111_v15, 16 }
  0x5c   : > { %2459 = vmatpush3.bf16.msra.mxu1 %v2760_v21  ;;  %v2805_v21 = vld [vmem:[%s2900_s16 + $0x60] sm:$0xff]  }
  0x5d   : > { %2555 = vmatpush3.bf16.msra.mxu0 %v2761_v23  ;;  %2460 = vmatprep.subr.bf16.mxu1 %v2762_v27  ;;  %v1783_v23 = vshrl.u32 %v2815_v11, 16 }
  0x5e   : > { %2556 = vmatprep.subr.bf16.mxu0 %v2763_v28 }
  0x5f   : > { %v1788_v31 = vor.u32 %v1787_v24, %v1783_v23 }
  0x60   : > { %2461 = vmatpush3.bf16.msra.mxu1 %v2762_v27  ;;  %v1802_v27 = vshrl.u32 %v2817_v12, 16 }
  0x61   : > { %2557 = vmatpush3.bf16.msra.mxu0 %v2763_v28  ;;  %2462 = vmatprep.subr.bf16.mxu1 %v2764_v29  ;;  %v1806_v28 = vshll.u32 %v3115_v18, 16 }
  0x62   : > { %2558 = vmatprep.subr.bf16.mxu0 %v2765_v30  ;;  %v1804_v34 = vor.u32 %v1802_v27, %v1800_v26 }
  0x63   : > { %v1808_v35 = vrot.slane %v1806_v28, 1 }
  0x64   : > { %2463 = vmatpush3.bf16.msra.mxu1 %v2764_v29  ;;  %v2809_v29 = vld [vmem:[%s3166_s1 + $0x210] sm:$0xff]  }
  0x65   : > { %2559 = vmatpush3.bf16.msra.mxu0 %v2765_v30  ;;  %2464 = vmatprep.subr.bf16.mxu1 %v2767_v32  ;;  %v2807_v30 = vld [vmem:[%s2900_s16 + $0x68] sm:$0xff]   ;;  %v1812_v47 = vor.u32 %v1810_v43, %v1808_v35 }
  0x66   : > { %2560 = vmatprep.subr.bf16.mxu0 %v2769_v33 }
  0x68   : > { %2465 = vmatpush3.bf16.msra.mxu1 %v2767_v32  ;;  %v1792_v32 = vrot.slane %v1790_v25, 1 }
  0x69   : > { %2561 = vmatpush3.bf16.msra.mxu0 %v2769_v33  ;;  %2466 = vmatprep.subr.bf16.mxu1 %v2772_v37  ;;  %v2808_v33 = vld [vmem:[%s2900_s16 + $0x48] sm:$0xff]  }
  0x6a   : > { %2562 = vmatprep.subr.bf16.mxu0 %v2773_v38 }
  0x6c   : > { %2467 = vmatpush3.bf16.msra.mxu1 %v2772_v37  ;;  %v1793_v37 = vsel %vm585_vm0, %v1788_v31, %v1792_v32 }
  0x6d   : > { %2563 = vmatpush3.bf16.msra.mxu0 %v2773_v38  ;;  %2476 = vmatprep.subr.bf16.mxu1 %v2776_v44  ;;  %v1809_v38 = vsel %vm585_vm0, %v1804_v34, %v1808_v35 }
  0x6e   : > { %2572 = vmatprep.subr.bf16.mxu0 %v2778_v45 }
  0x6f   : > { %2469 = vmatmul.mubr.bf16.vlgmr.msra.gmra.mrb[0].mxu1 %v605_v49 }
  0x70   : > { %2477 = vmatpush3.bf16.msra.mxu1 %v2776_v44  ;;  %2565 = vmatmul.mubr.bf16.vlgmr.msra.gmra.mrb[0].mxu0 %v2780_v46  ;;  %v1814_v44 = vshll.u32 %v2819_v41, 16  ;;  %v1794_v46 = vshrl.u32 %v3111_v15, 16 }
  0x71   : > { %2573 = vmatpush3.bf16.msra.mxu0 %v2778_v45  ;;  %2478 = vmatprep.subr.bf16.mxu1 %v2781_v52  ;;  %v2814_v45 = vld [vmem:[%s3166_s1 + $0x238] sm:$0xff]  }
  0x72   : > { %2574 = vmatprep.subr.bf16.mxu0 %v2782_v53  ;;  %2472 = vmatprep.mubr.bf16.mxu1 %v613_v54  ;;  %v1816_v48 = vrot.slane %v1814_v44, 1  ;;  %v1796_v49 = vor.u32 %v1794_v46, %v1792_v32 }
  0x73   : > { %2568 = vmatprep.mubr.bf16.mxu0 %v2792_v55 }
  0x74   : > { %2479 = vmatpush3.bf16.msra.mxu1 %v2781_v52  ;;  %v1817_v50 = vsel %vm585_vm0, %v1812_v47, %v1816_v48  ;;  %v1801_v51 = vsel %vm585_vm0, %v1796_v49, %v1800_v26  ;;  %v173_v52 = vld [vmem:[%s3167_s2] sm:$0x1] }
  0x75   : > { %2575 = vmatpush3.bf16.msra.mxu0 %v2782_v53  ;;  %2480 = vmatprep.subr.bf16.mxu1 %v2783_v58  ;;  %v174_v53 = vlaneseq }
  0x76   : > { %2576 = vmatprep.subr.bf16.mxu0 %v2784_v59 }
  0x77   : > { %2473 = vmatmul.mubr.bf16.gmra.mrb[4].mxu1 %v621_v61  ;;  %vm176_vm1 = vcmp.lt.s32.totalorder %v174_v53, 4 }
  0x78   : > { %2481 = vmatpush3.bf16.msra.mxu1 %v2783_v58  ;;  %2569 = vmatmul.mubr.bf16.gmra.mrb[4].mxu0 %v2795_v62  ;;  %v177_v54 = vsel %vm176_vm1, %v173_v52, %v9_v0 }
  0x79   : > { %2577 = vmatpush3.bf16.msra.mxu0 %v2784_v59  ;;  %2482 = vmatprep.subr.bf16.mxu1 %v2785_v60  ;;  %179 = vst [vmem:[#allocation8] sm:$0x1] %v177_v54 }
  0x7a   : > { %2578 = vmatprep.subr.bf16.mxu0 %v2786_v63  ;;  %2492 = vmatprep.mubr.bf16.mxu1 %v2799_v1 }
  0x7b   : > { %2588 = vmatprep.mubr.bf16.mxu0 %v2800_v2 }
  0x7c   : > { %2483 = vmatpush3.bf16.msra.mxu1 %v2785_v60 }
  0x7d   : > { %2579 = vmatpush3.bf16.msra.mxu0 %v2786_v63  ;;  %2484 = vmatprep.subr.bf16.mxu1 %v2787_v3 }
  0x7e   : > { %2580 = vmatprep.subr.bf16.mxu0 %v2788_v4 }
  0x80   : > { %2485 = vmatpush3.bf16.msra.mxu1 %v2787_v3 }
  0x81   : > { %2581 = vmatpush3.bf16.msra.mxu0 %v2788_v4  ;;  %2486 = vmatprep.subr.bf16.mxu1 %v2789_v5 }
  0x82   : > { %2582 = vmatprep.subr.bf16.mxu0 %v2790_v6 }
  0x84   : > { %2487 = vmatpush3.bf16.msra.mxu1 %v2789_v5 }
  0x85   : > { %2583 = vmatpush3.bf16.msra.mxu0 %v2790_v6  ;;  %2488 = vmatprep.subr.bf16.mxu1 %v2794_v7 }
  0x86   : > { %2584 = vmatprep.subr.bf16.mxu0 %v2796_v8 }
  0x88   : > { %2489 = vmatpush3.bf16.msra.mxu1 %v2794_v7 }
  0x89   : > { %2585 = vmatpush3.bf16.msra.mxu0 %v2796_v8  ;;  %2490 = vmatprep.subr.bf16.mxu1 %v2797_v9  ;;  %v2292_v8 = vld [vmem:[#allocation8] ss:$0 sm:$0xff] }
  0x8a   : > { %2586 = vmatprep.subr.bf16.mxu0 %v2798_v10 }
  0x8c   : > { %2491 = vmatpush3.bf16.msra.mxu1 %v2797_v9 }
  0x8d   : > { %2587 = vmatpush3.bf16.msra.mxu0 %v2798_v10  ;;  %2620 = vmatprep.subr.bf16.mxu1 %v2803_v13 }
  0x8e   : > { %2596 = vmatprep.subr.bf16.mxu0 %v2803_v13 }
  0x8f   : > { %2493 = vmatmul.mubr.bf16.vlgmr.msra.gmra.mrb[0].mxu1 %v2801_v14 }
  0x90   : > { %2589 = vmatmul.mubr.bf16.vlgmr.msra.gmra.mrb[0].mxu0 %v2802_v17  ;;  %2628 = vmatpush3.bf16.msra.mxu1 %v2803_v13 }
  0x91   : > { %2597 = vmatpush3.bf16.msra.mxu0 %v2803_v13  ;;  %2621 = vmatprep.subr.bf16.mxu1 %v2804_v20 }
  0x92   : > { %2598 = vmatprep.subr.bf16.mxu0 %v2804_v20  ;;  %2496 = vmatprep.mubr.bf16.mxu1 %v2805_v21 }
  0x93   : > { %2592 = vmatprep.mubr.bf16.mxu0 %v2806_v22 }
  0x94   : > { %2629 = vmatpush3.bf16.msra.mxu1 %v2804_v20 }
  0x95   : > { %2599 = vmatpush3.bf16.msra.mxu0 %v2804_v20  ;;  %2622 = vmatprep.subr.bf16.mxu1 %v2809_v29 }
  0x96   : > { %2600 = vmatprep.subr.bf16.mxu0 %v2809_v29 }
  0x97   : > { %2497 = vmatmul.mubr.bf16.gmra.mrb[4].mxu1 %v2807_v30 }
  0x98   : > { %2593 = vmatmul.mubr.bf16.gmra.mrb[4].mxu0 %v2808_v33  ;;  %2630 = vmatpush3.bf16.msra.mxu1 %v2809_v29 }
  0x99   : > { %2601 = vmatpush3.bf16.msra.mxu0 %v2809_v29  ;;  %2623 = vmatprep.subr.bf16.mxu1 %v2810_v36 }
  0x9a   : > { %2602 = vmatprep.subr.bf16.mxu0 %v2810_v36  ;;  %2612 = vmatprep.mubr.bf16.mxu0 %v1793_v37 }
  0x9b   : > { %2616 = vmatprep.mubr.bf16.mxu1 %v1809_v38 }
  0x9c   : > { %2631 = vmatpush3.bf16.msra.mxu1 %v2810_v36 }
  0x9d   : > { %2603 = vmatpush3.bf16.msra.mxu0 %v2810_v36  ;;  %2624 = vmatprep.subr.bf16.mxu1 %v2811_v39 }
  0x9e   : > { %2604 = vmatprep.subr.bf16.mxu0 %v2811_v39 }
  0xa0   : > { %2632 = vmatpush3.bf16.msra.mxu1 %v2811_v39 }
  0xa1   : > { %2605 = vmatpush3.bf16.msra.mxu0 %v2811_v39  ;;  %2625 = vmatprep.subr.bf16.mxu1 %v2812_v40 }
  0xa2   : > { %2606 = vmatprep.subr.bf16.mxu0 %v2812_v40 }
  0xa4   : > { %2633 = vmatpush3.bf16.msra.mxu1 %v2812_v40 }
  0xa5   : > { %2607 = vmatpush3.bf16.msra.mxu0 %v2812_v40  ;;  %2626 = vmatprep.subr.bf16.mxu1 %v2813_v42 }
  0xa6   : > { %2608 = vmatprep.subr.bf16.mxu0 %v2813_v42 }
  0xa8   : > { %2634 = vmatpush3.bf16.msra.mxu1 %v2813_v42 }
  0xa9   : > { %2609 = vmatpush3.bf16.msra.mxu0 %v2813_v42  ;;  %2627 = vmatprep.subr.bf16.mxu1 %v2814_v45 }
  0xaa   : > { %2610 = vmatprep.subr.bf16.mxu0 %v2814_v45 }
  0xac   : > { %2635 = vmatpush3.bf16.msra.mxu1 %v2814_v45 }
  0xad   : > { %2611 = vmatpush3.bf16.msra.mxu0 %v2814_v45 }
  0xaf   : > { %2617 = vmatmul.mubr.bf16.vlgmr.msra.gmra.mrb[8].mxu1 %v1817_v50 }
  0xb0   : > { %2613 = vmatmul.mubr.bf16.vlgmr.msra.gmra.mrb[0].mxu0 %v1801_v51 }
 0x162   : > { %v2494_v55 = vpop.f32.mrb[0].mxu1 }
 0x163   : > { %v894_v56 = vpop.f32.mrb[1].mxu1 }
 0x164   : > { %v2495_v57 = vpop.f32.mrb[2].mxu1 }
 0x165   : > { %v897_v58 = vpop.f32.mrb[3].mxu1 }
 0x16a   : > { %v2498_v59 = vpop.f32.mrb[4].mxu1 }
 0x16b   : > { %v2594_v60 = vpop.f32.mrb[4].mxu0  ;;  %v910_v61 = vpop.f32.mrb[5].mxu1 }
 0x16c   : > { %v2640_v62 = vadd.f32 %v2594_v60, %v2498_v59  ;;  %v1694_v63 = vpop.f32.mrb[5].mxu0  ;;  %v2499_v1 = vpop.f32.mrb[6].mxu1 }
 0x16d   : > { %v2642_v2 = vadd.f32 %v1694_v63, %v910_v61  ;;  %v2595_v3 = vpop.f32.mrb[6].mxu0  ;;  %v913_v4 = vpop.f32.mrb[7].mxu1 }
 0x16e   : > { %v2644_v5 = vadd.f32 %v2595_v3, %v2499_v1  ;;  %v1697_v6 = vpop.f32.mrb[7].mxu0 }
 0x16f   : > { %v2646_v7 = vadd.f32 %v1697_v6, %v913_v4 }
 0x182   : > { %v2618_v9 = vpop.f32.mrb[8].mxu1 }
 0x183   : > { %v2614_v10 = vpop.f32.mrb[0].mxu0  ;;  %v2641_v11 = vadd.f32 %v2640_v62, %v2618_v9  ;;  %v1920_v12 = vpop.f32.mrb[9].mxu1 }
 0x184   : > { %v2636_v13 = vadd.f32 %v2614_v10, %v2494_v55  ;;  %v1904_v14 = vpop.f32.mrb[1].mxu0  ;;  %v2643_v15 = vadd.f32 %v2642_v2, %v1920_v12  ;;  %v2619_v16 = vpop.f32.mrb[10].mxu1 }
 0x185   : > { %v1980_v17 = vadd.f32 %v2641_v11, %v2292_v8  ;;  %v2637_v18 = vadd.f32 %v1904_v14, %v894_v56  ;;  %v2615_v19 = vpop.f32.mrb[2].mxu0  ;;  %v2645_v20 = vadd.f32 %v2644_v5, %v2619_v16  ;;  %v1923_v21 = vpop.f32.mrb[11].mxu1 }
 0x186   : > { %v1976_v22 = vadd.f32 %v2636_v13, %v2292_v8  ;;  %v1978_v23 = vadd.f32 %v2643_v15, %v2292_v8  ;;  %v2638_v24 = vadd.f32 %v2615_v19, %v2495_v57  ;;  %v1907_v25 = vpop.f32.mrb[3].mxu0  ;;  %v2647_v26 = vadd.f32 %v2646_v7, %v1923_v21 }
 0x187   : > { %1988 = vst [vmem:[%s172_s8 + $0x30] sm:$0xff] %v1980_v17  ;;  %v1974_v27 = vadd.f32 %v2637_v18, %v2292_v8  ;;  %v1981_v28 = vadd.f32 %v2645_v20, %v2292_v8  ;;  %v2639_v29 = vadd.f32 %v1907_v25, %v897_v58 }
 0x188   : > { %1984 = vst [vmem:[%s172_s8 + $0x10] sm:$0xff] %v1976_v22  ;;  %1986 = vst [vmem:[%s172_s8 + $0x20] sm:$0xff] %v1978_v23  ;;  %v1977_v30 = vadd.f32 %v2638_v24, %v2292_v8  ;;  %v1979_v31 = vadd.f32 %v2647_v26, %v2292_v8 }
 0x189   : > { %1982 = vst [vmem:[%s172_s8] sm:$0xff] %v1974_v27  ;;  %1989 = vst [vmem:[%s172_s8 + $0x38] sm:$0xff] %v1981_v28  ;;  %v1975_v32 = vadd.f32 %v2639_v29, %v2292_v8 }
 0x18a   : > { %1985 = vst [vmem:[%s172_s8 + $0x18] sm:$0xff] %v1977_v30  ;;  %1987 = vst [vmem:[%s172_s8 + $0x28] sm:$0xff] %v1979_v31 }
 0x18b   : > { %1983 = vst [vmem:[%s172_s8 + $0x8] sm:$0xff] %v1975_v32 }
 0x18c PF: > { %s15_s17 = sadd.s32 1, %s2826_s17  }
 0x18d   : > { %p12_p4 = scmp.ge.s32.totalorder %s15_s17, 4  }
 0x18f   :  { %14 = sbr.rel (!%p12_p4) target bundleno = 2 (0x2), region = 70 }

</bundles_post_ra>
